<compile_context>
chip_gen: v7x
topology: tpu7x:2x2x1
jax: 0.10.0
libtpu: 0.0.40
codegen_flags: <defaults>
</compile_context>

<pallas_src>
import functools

import numpy as np

import jax
import jax.numpy as jnp
from jax import lax
from jax.experimental import pallas as pl
from jax.experimental.pallas import tpu as pltpu


# ----------------------------------------------------------------------------
# Fused kernel (one grid step == one image)
# ----------------------------------------------------------------------------
def make_kernel(cfg):
    K = cfg["K"]        # conv kernel size (3)
    H1 = cfg["H1"]      # conv1 output spatial size (28)
    H2 = cfg["H2"]      # conv2 output spatial size (14)
    Q2 = cfg["Q2"]      # pool2 output spatial size (7)

    def kernel(x_ref,                     # (1, H+2P, (W+2P)*Cin)  bf16, padded flat rows
               a1_ref, b1_ref,            # banded conv1 weights / flat bias
               s1_ref, r1_ref,            # pool1 column / row 0-1 selection mats
               a2_ref, b2_ref,            # banded conv2 weights / flat bias
               s2_ref, r2_ref,            # pool2 selection mats
               v_ref, bfc_ref,            # classifier weights (NCHW-flatten folded in) / bias
               o_ref,                     # (1, 1, OUT) f32
               p1_ref, f2_ref):           # VMEM scratch: padded pool1, pool2 features

        def conv_relu(get_rows, a_ref, bias_ref):
            # y[i, j*Co+o] = relu( b[o] + sum_kh rows_kh[i, :] @ A[kh] )
            acc = None
            for kh in range(K):
                part = jnp.dot(get_rows(kh), a_ref[kh],
                               preferred_element_type=jnp.float32)
                acc = part if acc is None else acc + part
            return jnp.maximum(acc + bias_ref[...], 0.0)

        def pool2x2(y, s_ref, r_ref):
            # exact 2x2/stride-2 max pool via 0/1 selection matmuls + max.
            yb = y.astype(jnp.bfloat16)
            m = jnp.maximum(
                jnp.dot(yb, s_ref[0], preferred_element_type=jnp.float32),
                jnp.dot(yb, s_ref[1], preferred_element_type=jnp.float32))
            mb = m.astype(jnp.bfloat16)
            return jnp.maximum(
                jnp.dot(r_ref[0], mb, preferred_element_type=jnp.float32),
                jnp.dot(r_ref[1], mb, preferred_element_type=jnp.float32))

        # ---- block 1: conv + relu, then pool (result already zero-padded) ----
        y1 = conv_relu(lambda kh: x_ref[0, pl.ds(kh, H1), :], a1_ref, b1_ref)
        p1_ref[...] = pool2x2(y1, s1_ref, r1_ref)          # (H2+2P, (H2+2P)*C)

        # ---- block 2: conv + relu, then pool ----
        y2 = conv_relu(
            lambda kh: p1_ref[pl.ds(kh, H2), :].astype(jnp.bfloat16),
            a2_ref, b2_ref)
        f2_ref[...] = pool2x2(y2, s2_ref, r2_ref)           # (Q2, Q2*C)

        # ---- classifier (flatten order folded into v_ref) ----
        acc = bfc_ref[...]                                  # (1, OUT) f32
        for h in range(Q2):
            row = f2_ref[pl.ds(h, 1), :].astype(jnp.bfloat16)   # (1, Q2*C)
            acc = acc + jnp.dot(row, v_ref[h],
                                preferred_element_type=jnp.float32)
        o_ref[0] = acc

    return kernel


# ----------------------------------------------------------------------------
# Forward builder (wrapper around the single pallas_call)
# ----------------------------------------------------------------------------
def build_forward(hp):
    K, P, S = hp["ksize"], hp["padding"], hp["stride"]
    assert S == 1, "banded-conv formulation assumes stride 1"
    C0, C, OUT = hp["input"], hp["hidden"], hp["output"]
    H = hp["img"]

    H1 = H - K + 2 * P + 1          # conv1 out spatial
    assert H1 % 2 == 0
    Q1 = H1 // 2                    # pool1 out spatial
    Hp2 = Q1 + 2 * P                # conv2 padded input spatial
    H2 = Q1 - K + 2 * P + 1         # conv2 out spatial
    assert H2 % 2 == 0
    Q2 = H2 // 2                    # pool2 out spatial
    Hp1 = H + 2 * P                 # conv1 padded input spatial

    cfg = dict(K=K, H1=H1, H2=H2, Q2=Q2)
    kernel = make_kernel(cfg)

    def forward(x_nchw, kp):
        B = x_nchw.shape[0]
        # tiny per-call layout prep of the raw input (≈10 KB): NCHW -> padded
        # flat NHWC rows (B, Hp1, Wp1*Cin), bf16.
        x = jnp.transpose(x_nchw, (0, 2, 3, 1))
        x = jnp.pad(x, ((0, 0), (P, P), (P, P), (0, 0)))
        x = x.reshape(B, Hp1, Hp1 * C0).astype(jnp.bfloat16)

        def fullspec(a):
            nd = a.ndim
            return pl.BlockSpec(a.shape, lambda b, _n=nd: (0,) * _n)

        consts = [kp["a1"], kp["b1"], kp["s1"], kp["r1"],
                  kp["a2"], kp["b2"], kp["s2"], kp["r2"],
                  kp["v"], kp["bfc"]]

        out = pl.pallas_call(
            kernel,
            out_shape=jax.ShapeDtypeStruct((B, 1, OUT), jnp.float32),
            grid=(B,),
            in_specs=[pl.BlockSpec((1, Hp1, Hp1 * C0), lambda b: (b, 0, 0))]
                     + [fullspec(a) for a in consts],
            out_specs=pl.BlockSpec((1, 1, OUT), lambda b: (b, 0, 0)),
            scratch_shapes=[
                pltpu.VMEM((Hp2, Hp2 * C), jnp.float32),   # padded pool1 output
                pltpu.VMEM((Q2, Q2 * C), jnp.float32),     # pool2 features
            ],
            compiler_params=pltpu.CompilerParams(
                dimension_semantics=("parallel",)),        # v7x: batch over 2 TCs
        )(x, *consts)
        return out.reshape(B, OUT)

    return forward, cfg


# ----------------------------------------------------------------------------
# One-time host-side weight packing (torch layouts -> kernel layouts)
# ----------------------------------------------------------------------------
def prepare_kernel_params(params, hp):
    K, P = hp["ksize"], hp["padding"]
    C0, C, OUT = hp["input"], hp["hidden"], hp["output"]
    H = hp["img"]
    H1 = H - K + 2 * P + 1
    Q1 = H1 // 2
    Hp2 = Q1 + 2 * P
    H2 = Q1 - K + 2 * P + 1
    Q2 = H2 // 2
    Hp1 = H + 2 * P

    w1 = np.asarray(params["w1"], np.float32)    # (C, C0, K, K)   torch OIHW
    w2 = np.asarray(params["w2"], np.float32)    # (C, C,  K, K)
    wfc = np.asarray(params["w_fc"], np.float32)  # (OUT, C*Q2*Q2)  torch Linear

    def banded(w, win_pad, wout, cin, cout):
        # A[kh, jp*cin + c, j*cout + o] = w[o, c, kh, jp - j]  for 0 <= jp-j < K
        A = np.zeros((K, win_pad * cin, wout * cout), np.float32)
        for kh in range(K):
            for kw in range(K):
                blk = w[:, :, kh, kw].T          # (cin, cout)
                for j in range(wout):
                    jp = j + kw
                    A[kh, jp * cin:(jp + 1) * cin, j * cout:(j + 1) * cout] = blk
        return A

    def colsel(win, wout, cout, colpad):
        # even/odd column (W) selection for 2x2 pool; zero cols = W zero-padding
        Se = np.zeros((win * cout, (wout + 2 * colpad) * cout), np.float32)
        So = np.zeros_like(Se)
        for j in range(wout):
            for o in range(cout):
                Se[(2 * j) * cout + o, (colpad + j) * cout + o] = 1.0
                So[(2 * j + 1) * cout + o, (colpad + j) * cout + o] = 1.0
        return Se, So

    def rowsel(hin, hout, rowpad):
        Re = np.zeros((hout + 2 * rowpad, hin), np.float32)
        Ro = np.zeros_like(Re)
        for r in range(hout):
            Re[rowpad + r, 2 * r] = 1.0
            Ro[rowpad + r, 2 * r + 1] = 1.0
        return Re, Ro

    A1 = banded(w1, Hp1, H1, C0, C)          # (K, Hp1*C0, H1*C)
    A2 = banded(w2, Hp2, H2, C, C)           # (K, Hp2*C,  H2*C)
    S1e, S1o = colsel(H1, Q1, C, P)          # (H1*C, Hp2*C)  incl. zero pad cols
    R1e, R1o = rowsel(H1, Q1, P)             # (Hp2, H1)      incl. zero pad rows
    S2e, S2o = colsel(H2, Q2, C, 0)          # (H2*C, Q2*C)
    R2e, R2o = rowsel(H2, Q2, 0)             # (Q2, H2)

    # Classifier weight, with PyTorch NCHW flatten order folded in:
    # V[h, w*C + c, k] = Wfc[k, c*Q2*Q2 + h*Q2 + w]
    V = wfc.reshape(OUT, C, Q2, Q2).transpose(2, 3, 1, 0).reshape(Q2, Q2 * C, OUT)

    bf = lambda a: jnp.asarray(a, jnp.bfloat16)
    f32 = lambda a: jnp.asarray(a, jnp.float32)
    return {
        "a1": bf(A1),
        "b1": f32(np.tile(np.asarray(params["b1"], np.float32), H1)[None, :]),
        "s1": bf(np.stack([S1e, S1o])),
        "r1": bf(np.stack([R1e, R1o])),
        "a2": bf(A2),
        "b2": f32(np.tile(np.asarray(params["b2"], np.float32), H2)[None, :]),
        "s2": bf(np.stack([S2e, S2o])),
        "r2": bf(np.stack([R2e, R2o])),
        "v": bf(V),
        "bfc": f32(np.asarray(params["b_fc"], np.float32)[None, :]),
    }


# ----------------------------------------------------------------------------
# Plain-JAX reference (mirrors the PyTorch module exactly, f32)
# ----------------------------------------------------------------------------
def reference_forward(x, params, P=1):
    y = lax.conv_general_dilated(x, params["w1"], (1, 1), ((P, P), (P, P)),
                                 dimension_numbers=("NCHW", "OIHW", "NCHW"))
    y = jax.nn.relu(y + params["b1"][None, :, None, None])
    y = lax.reduce_window(y, -jnp.inf, lax.max, (1, 1, 2, 2), (1, 1, 2, 2), "VALID")
    y = lax.conv_general_dilated(y, params["w2"], (1, 1), ((P, P), (P, P)),
                                 dimension_numbers=("NCHW", "OIHW", "NCHW"))
    y = jax.nn.relu(y + params["b2"][None, :, None, None])
    y = lax.reduce_window(y, -jnp.inf, lax.max, (1, 1, 2, 2), (1, 1, 2, 2), "VALID")
    flat = y.reshape(y.shape[0], -1)                       # NCHW flatten, like nn.Flatten
    return flat @ params["w_fc"].T + params["b_fc"]


def init_params(key, in_ch, hidden, out_dim, ksize, n):
    ks = jax.random.split(key, 6)
    fan1 = in_ch * ksize * ksize
    fan2 = hidden * ksize * ksize
    fan3 = hidden * n * n
    return {
        "w1": jax.random.normal(ks[0], (hidden, in_ch, ksize, ksize), jnp.float32)
        * (1.0 / fan1) ** 0.5,
        "b1": jax.random.normal(ks[1], (hidden,), jnp.float32) * 0.01,
        "w2": jax.random.normal(ks[2], (hidden, hidden, ksize, ksize), jnp.float32)
        * (1.0 / fan2) ** 0.5,
        "b2": jax.random.normal(ks[3], (hidden,), jnp.float32) * 0.01,
        "w_fc": jax.random.normal(ks[4], (out_dim, fan3), jnp.float32)
        * (1.0 / fan3) ** 0.5,
        "b_fc": jax.random.normal(ks[5], (out_dim,), jnp.float32) * 0.01,
    }


if __name__ == "__main__":
    # Module hyperparameters (image_input_shape is hard-coded to 28 in the module).
    hp = dict(input=3, hidden=8, output=10, ksize=3, padding=1, stride=1, img=28)

    conv_sz = lambda m: (m - hp["ksize"] + 2 * hp["padding"]) // hp["stride"] + 1
    pool_sz = lambda m: (m - 2) // 2 + 1
    n = pool_sz(conv_sz(pool_sz(conv_sz(hp["img"]))))      # = 7

    key = jax.random.PRNGKey(0)
    kx, kp_key = jax.random.split(key)
    B = 2
    x = jax.random.normal(kx, (B, hp["input"], hp["img"], hp["img"]), jnp.float32)

    params = init_params(kp_key, hp["input"], hp["hidden"], hp["output"], hp["ksize"], n)
    kparams = prepare_kernel_params(params, hp)            # one-time host packing

    forward, _ = build_forward(hp)
    fwd = jax.jit(forward)
    logits = fwd(x, kparams)
    jax.block_until_ready(logits)
    assert logits.shape == (B, hp["output"]), logits.shape

    # Sanity check vs. the f32 XLA reference (kernel uses bf16 matmul operands,
    # so allow a loose absolute tolerance).
    ref = reference_forward(x, params, P=hp["padding"])
    err = float(jnp.max(jnp.abs(logits - ref)))
    assert err < 0.35, f"kernel deviates from reference: max abs err {err}"

    print("KERNEL_OK")
</pallas_src>

<mosaic_0001>
module attributes {stable_mosaic.version = 11 : i64} {
  func.func @kernel(%arg0: i32, %arg1: memref<1x30x90xbf16, #tpu.memory_space<vmem>>, %arg2: memref<3x90x224xbf16, #tpu.memory_space<vmem>>, %arg3: memref<1x224xf32, #tpu.memory_space<vmem>>, %arg4: memref<2x224x128xbf16, #tpu.memory_space<vmem>>, %arg5: memref<2x16x28xbf16, #tpu.memory_space<vmem>>, %arg6: memref<3x128x112xbf16, #tpu.memory_space<vmem>>, %arg7: memref<1x112xf32, #tpu.memory_space<vmem>>, %arg8: memref<2x112x56xbf16, #tpu.memory_space<vmem>>, %arg9: memref<2x7x14xbf16, #tpu.memory_space<vmem>>, %arg10: memref<7x56x10xbf16, #tpu.memory_space<vmem>>, %arg11: memref<1x10xf32, #tpu.memory_space<vmem>>, %arg12: memref<1x1x10xf32, #tpu.memory_space<vmem>>, %arg13: memref<16x128xf32, #tpu.memory_space<vmem>>, %arg14: memref<7x56xf32, #tpu.memory_space<vmem>>) attributes {dimension_semantics = [#tpu.dimension_semantics<parallel>], iteration_bounds = array<i64: 2>, scalar_prefetch = 0 : i64, scratch_operands = 2 : i64, tpu.core_type = #tpu.core_type<tc>, window_params = [{transform_indices = @transform_0, window_bounds = array<i64: 1, 30, 90>}, {pipeline_mode = #tpu.pipeline_mode<synchronous>, transform_indices = @transform_1, window_bounds = array<i64: 3, 90, 224>}, {pipeline_mode = #tpu.pipeline_mode<synchronous>, transform_indices = @transform_2, window_bounds = array<i64: 1, 224>}, {pipeline_mode = #tpu.pipeline_mode<synchronous>, transform_indices = @transform_3, window_bounds = array<i64: 2, 224, 128>}, {pipeline_mode = #tpu.pipeline_mode<synchronous>, transform_indices = @transform_4, window_bounds = array<i64: 2, 16, 28>}, {pipeline_mode = #tpu.pipeline_mode<synchronous>, transform_indices = @transform_5, window_bounds = array<i64: 3, 128, 112>}, {pipeline_mode = #tpu.pipeline_mode<synchronous>, transform_indices = @transform_6, window_bounds = array<i64: 1, 112>}, {pipeline_mode = #tpu.pipeline_mode<synchronous>, transform_indices = @transform_7, window_bounds = array<i64: 2, 112, 56>}, {pipeline_mode = #tpu.pipeline_mode<synchronous>, transform_indices = @transform_8, window_bounds = array<i64: 2, 7, 14>}, {pipeline_mode = #tpu.pipeline_mode<synchronous>, transform_indices = @transform_9, window_bounds = array<i64: 7, 56, 10>}, {pipeline_mode = #tpu.pipeline_mode<synchronous>, transform_indices = @transform_10, window_bounds = array<i64: 1, 10>}, {transform_indices = @transform_11, window_bounds = array<i64: 1, 1, 10>}]} {
    %c0 = arith.constant 0 : index
    %c0_0 = arith.constant 0 : index
    %c0_1 = arith.constant 0 : index
    %0 = vector.load %arg1[%c0, %c0_0, %c0_1] : memref<1x30x90xbf16, #tpu.memory_space<vmem>>, vector<1x28x90xbf16>
    %1 = vector.shape_cast %0 : vector<1x28x90xbf16> to vector<28x90xbf16>
    %c0_2 = arith.constant 0 : index
    %c0_3 = arith.constant 0 : index
    %c0_4 = arith.constant 0 : index
    %2 = vector.load %arg2[%c0_2, %c0_3, %c0_4] : memref<3x90x224xbf16, #tpu.memory_space<vmem>>, vector<1x90x224xbf16>
    %3 = vector.shape_cast %2 : vector<1x90x224xbf16> to vector<90x224xbf16>
    %cst = arith.constant dense<0.000000e+00> : vector<28x224xf32>
    %4 = tpu.matmul %1, %3, %cst {dimension_numbers = #tpu.dot_dimension_numbers<[1], [0], [0], [1], [0, 0, 1, 1], [], []>} : vector<28x90xbf16>, vector<90x224xbf16>, vector<28x224xf32> -> vector<28x224xf32>
    %c0_5 = arith.constant 0 : index
    %c1 = arith.constant 1 : index
    %c0_6 = arith.constant 0 : index
    %5 = vector.load %arg1[%c0_5, %c1, %c0_6] : memref<1x30x90xbf16, #tpu.memory_space<vmem>>, vector<1x28x90xbf16>
    %6 = vector.shape_cast %5 : vector<1x28x90xbf16> to vector<28x90xbf16>
    %c1_7 = arith.constant 1 : index
    %c0_8 = arith.constant 0 : index
    %c0_9 = arith.constant 0 : index
    %7 = vector.load %arg2[%c1_7, %c0_8, %c0_9] : memref<3x90x224xbf16, #tpu.memory_space<vmem>>, vector<1x90x224xbf16>
    %8 = vector.shape_cast %7 : vector<1x90x224xbf16> to vector<90x224xbf16>
    %cst_10 = arith.constant dense<0.000000e+00> : vector<28x224xf32>
    %9 = tpu.matmul %6, %8, %cst_10 {dimension_numbers = #tpu.dot_dimension_numbers<[1], [0], [0], [1], [0, 0, 1, 1], [], []>} : vector<28x90xbf16>, vector<90x224xbf16>, vector<28x224xf32> -> vector<28x224xf32>
    %10 = arith.addf %4, %9 : vector<28x224xf32>
    %c0_11 = arith.constant 0 : index
    %c2 = arith.constant 2 : index
    %c0_12 = arith.constant 0 : index
    %11 = vector.load %arg1[%c0_11, %c2, %c0_12] : memref<1x30x90xbf16, #tpu.memory_space<vmem>>, vector<1x28x90xbf16>
    %12 = vector.shape_cast %11 : vector<1x28x90xbf16> to vector<28x90xbf16>
    %c2_13 = arith.constant 2 : index
    %c0_14 = arith.constant 0 : index
    %c0_15 = arith.constant 0 : index
    %13 = vector.load %arg2[%c2_13, %c0_14, %c0_15] : memref<3x90x224xbf16, #tpu.memory_space<vmem>>, vector<1x90x224xbf16>
    %14 = vector.shape_cast %13 : vector<1x90x224xbf16> to vector<90x224xbf16>
    %cst_16 = arith.constant dense<0.000000e+00> : vector<28x224xf32>
    %15 = tpu.matmul %12, %14, %cst_16 {dimension_numbers = #tpu.dot_dimension_numbers<[1], [0], [0], [1], [0, 0, 1, 1], [], []>} : vector<28x90xbf16>, vector<90x224xbf16>, vector<28x224xf32> -> vector<28x224xf32>
    %16 = arith.addf %10, %15 : vector<28x224xf32>
    %c0_17 = arith.constant 0 : index
    %c0_18 = arith.constant 0 : index
    %17 = vector.load %arg3[%c0_17, %c0_18] : memref<1x224xf32, #tpu.memory_space<vmem>>, vector<1x224xf32>
    %18 = vector.broadcast %17 : vector<1x224xf32> to vector<28x224xf32>
    %19 = arith.addf %16, %18 : vector<28x224xf32>
    %cst_19 = arith.constant 0.000000e+00 : f32
    %20 = vector.broadcast %cst_19 : f32 to vector<28x224xf32>
    %21 = arith.maximumf %19, %20 : vector<28x224xf32>
    %22 = arith.truncf %21 : vector<28x224xf32> to vector<28x224xbf16>
    %c0_20 = arith.constant 0 : index
    %c0_21 = arith.constant 0 : index
    %c0_22 = arith.constant 0 : index
    %23 = vector.load %arg4[%c0_20, %c0_21, %c0_22] : memref<2x224x128xbf16, #tpu.memory_space<vmem>>, vector<1x224x128xbf16>
    %24 = vector.shape_cast %23 : vector<1x224x128xbf16> to vector<224x128xbf16>
    %cst_23 = arith.constant dense<0.000000e+00> : vector<28x128xf32>
    %25 = tpu.matmul %22, %24, %cst_23 {dimension_numbers = #tpu.dot_dimension_numbers<[1], [0], [0], [1], [0, 0, 1, 1], [], []>} : vector<28x224xbf16>, vector<224x128xbf16>, vector<28x128xf32> -> vector<28x128xf32>
    %c1_24 = arith.constant 1 : index
    %c0_25 = arith.constant 0 : index
    %c0_26 = arith.constant 0 : index
    %26 = vector.load %arg4[%c1_24, %c0_25, %c0_26] : memref<2x224x128xbf16, #tpu.memory_space<vmem>>, vector<1x224x128xbf16>
    %27 = vector.shape_cast %26 : vector<1x224x128xbf16> to vector<224x128xbf16>
    %cst_27 = arith.constant dense<0.000000e+00> : vector<28x128xf32>
    %28 = tpu.matmul %22, %27, %cst_27 {dimension_numbers = #tpu.dot_dimension_numbers<[1], [0], [0], [1], [0, 0, 1, 1], [], []>} : vector<28x224xbf16>, vector<224x128xbf16>, vector<28x128xf32> -> vector<28x128xf32>
    %29 = arith.maximumf %25, %28 : vector<28x128xf32>
    %30 = arith.truncf %29 : vector<28x128xf32> to vector<28x128xbf16>
    %c0_28 = arith.constant 0 : index
    %c0_29 = arith.constant 0 : index
    %c0_30 = arith.constant 0 : index
    %31 = vector.load %arg5[%c0_28, %c0_29, %c0_30] : memref<2x16x28xbf16, #tpu.memory_space<vmem>>, vector<1x16x28xbf16>
    %32 = vector.shape_cast %31 : vector<1x16x28xbf16> to vector<16x28xbf16>
    %cst_31 = arith.constant dense<0.000000e+00> : vector<16x128xf32>
    %33 = tpu.matmul %32, %30, %cst_31 {dimension_numbers = #tpu.dot_dimension_numbers<[1], [0], [0], [1], [0, 0, 1, 1], [], []>} : vector<16x28xbf16>, vector<28x128xbf16>, vector<16x128xf32> -> vector<16x128xf32>
    %c1_32 = arith.constant 1 : index
    %c0_33 = arith.constant 0 : index
    %c0_34 = arith.constant 0 : index
    %34 = vector.load %arg5[%c1_32, %c0_33, %c0_34] : memref<2x16x28xbf16, #tpu.memory_space<vmem>>, vector<1x16x28xbf16>
    %35 = vector.shape_cast %34 : vector<1x16x28xbf16> to vector<16x28xbf16>
    %cst_35 = arith.constant dense<0.000000e+00> : vector<16x128xf32>
    %36 = tpu.matmul %35, %30, %cst_35 {dimension_numbers = #tpu.dot_dimension_numbers<[1], [0], [0], [1], [0, 0, 1, 1], [], []>} : vector<16x28xbf16>, vector<28x128xbf16>, vector<16x128xf32> -> vector<16x128xf32>
    %37 = arith.maximumf %33, %36 : vector<16x128xf32>
    %c0_36 = arith.constant 0 : index
    %c0_37 = arith.constant 0 : index
    %38 = vector.load %arg13[%c0_36, %c0_37] : memref<16x128xf32, #tpu.memory_space<vmem>>, vector<16x128xf32>
    tpu.vector_store %arg13[%c0_36, %c0_37], %37 {strides = array<i32>} : memref<16x128xf32, #tpu.memory_space<vmem>>, vector<16x128xf32>,
    %c0_38 = arith.constant 0 : index
    %c0_39 = arith.constant 0 : index
    %39 = vector.load %arg13[%c0_38, %c0_39] : memref<16x128xf32, #tpu.memory_space<vmem>>, vector<14x128xf32>
    %40 = arith.truncf %39 : vector<14x128xf32> to vector<14x128xbf16>
    %c0_40 = arith.constant 0 : index
    %c0_41 = arith.constant 0 : index
    %c0_42 = arith.constant 0 : index
    %41 = vector.load %arg6[%c0_40, %c0_41, %c0_42] : memref<3x128x112xbf16, #tpu.memory_space<vmem>>, vector<1x128x112xbf16>
    %42 = vector.shape_cast %41 : vector<1x128x112xbf16> to vector<128x112xbf16>
    %cst_43 = arith.constant dense<0.000000e+00> : vector<14x112xf32>
    %43 = tpu.matmul %40, %42, %cst_43 {dimension_numbers = #tpu.dot_dimension_numbers<[1], [0], [0], [1], [0, 0, 1, 1], [], []>} : vector<14x128xbf16>, vector<128x112xbf16>, vector<14x112xf32> -> vector<14x112xf32>
    %c1_44 = arith.constant 1 : index
    %c0_45 = arith.constant 0 : index
    %44 = vector.load %arg13[%c1_44, %c0_45] : memref<16x128xf32, #tpu.memory_space<vmem>>, vector<14x128xf32>
    %45 = arith.truncf %44 : vector<14x128xf32> to vector<14x128xbf16>
    %c1_46 = arith.constant 1 : index
    %c0_47 = arith.constant 0 : index
    %c0_48 = arith.constant 0 : index
    %46 = vector.load %arg6[%c1_46, %c0_47, %c0_48] : memref<3x128x112xbf16, #tpu.memory_space<vmem>>, vector<1x128x112xbf16>
    %47 = vector.shape_cast %46 : vector<1x128x112xbf16> to vector<128x112xbf16>
    %cst_49 = arith.constant dense<0.000000e+00> : vector<14x112xf32>
    %48 = tpu.matmul %45, %47, %cst_49 {dimension_numbers = #tpu.dot_dimension_numbers<[1], [0], [0], [1], [0, 0, 1, 1], [], []>} : vector<14x128xbf16>, vector<128x112xbf16>, vector<14x112xf32> -> vector<14x112xf32>
    %49 = arith.addf %43, %48 : vector<14x112xf32>
    %c2_50 = arith.constant 2 : index
    %c0_51 = arith.constant 0 : index
    %50 = vector.load %arg13[%c2_50, %c0_51] : memref<16x128xf32, #tpu.memory_space<vmem>>, vector<14x128xf32>
    %51 = arith.truncf %50 : vector<14x128xf32> to vector<14x128xbf16>
    %c2_52 = arith.constant 2 : index
    %c0_53 = arith.constant 0 : index
    %c0_54 = arith.constant 0 : index
    %52 = vector.load %arg6[%c2_52, %c0_53, %c0_54] : memref<3x128x112xbf16, #tpu.memory_space<vmem>>, vector<1x128x112xbf16>
    %53 = vector.shape_cast %52 : vector<1x128x112xbf16> to vector<128x112xbf16>
    %cst_55 = arith.constant dense<0.000000e+00> : vector<14x112xf32>
    %54 = tpu.matmul %51, %53, %cst_55 {dimension_numbers = #tpu.dot_dimension_numbers<[1], [0], [0], [1], [0, 0, 1, 1], [], []>} : vector<14x128xbf16>, vector<128x112xbf16>, vector<14x112xf32> -> vector<14x112xf32>
    %55 = arith.addf %49, %54 : vector<14x112xf32>
    %c0_56 = arith.constant 0 : index
    %c0_57 = arith.constant 0 : index
    %56 = vector.load %arg7[%c0_56, %c0_57] : memref<1x112xf32, #tpu.memory_space<vmem>>, vector<1x112xf32>
    %57 = vector.broadcast %56 : vector<1x112xf32> to vector<14x112xf32>
    %58 = arith.addf %55, %57 : vector<14x112xf32>
    %cst_58 = arith.constant 0.000000e+00 : f32
    %59 = vector.broadcast %cst_58 : f32 to vector<14x112xf32>
    %60 = arith.maximumf %58, %59 : vector<14x112xf32>
    %61 = arith.truncf %60 : vector<14x112xf32> to vector<14x112xbf16>
    %c0_59 = arith.constant 0 : index
    %c0_60 = arith.constant 0 : index
    %c0_61 = arith.constant 0 : index
    %62 = vector.load %arg8[%c0_59, %c0_60, %c0_61] : memref<2x112x56xbf16, #tpu.memory_space<vmem>>, vector<1x112x56xbf16>
    %63 = vector.shape_cast %62 : vector<1x112x56xbf16> to vector<112x56xbf16>
    %cst_62 = arith.constant dense<0.000000e+00> : vector<14x56xf32>
    %64 = tpu.matmul %61, %63, %cst_62 {dimension_numbers = #tpu.dot_dimension_numbers<[1], [0], [0], [1], [0, 0, 1, 1], [], []>} : vector<14x112xbf16>, vector<112x56xbf16>, vector<14x56xf32> -> vector<14x56xf32>
    %c1_63 = arith.constant 1 : index
    %c0_64 = arith.constant 0 : index
    %c0_65 = arith.constant 0 : index
    %65 = vector.load %arg8[%c1_63, %c0_64, %c0_65] : memref<2x112x56xbf16, #tpu.memory_space<vmem>>, vector<1x112x56xbf16>
    %66 = vector.shape_cast %65 : vector<1x112x56xbf16> to vector<112x56xbf16>
    %cst_66 = arith.constant dense<0.000000e+00> : vector<14x56xf32>
    %67 = tpu.matmul %61, %66, %cst_66 {dimension_numbers = #tpu.dot_dimension_numbers<[1], [0], [0], [1], [0, 0, 1, 1], [], []>} : vector<14x112xbf16>, vector<112x56xbf16>, vector<14x56xf32> -> vector<14x56xf32>
    %68 = arith.maximumf %64, %67 : vector<14x56xf32>
    %69 = arith.truncf %68 : vector<14x56xf32> to vector<14x56xbf16>
    %c0_67 = arith.constant 0 : index
    %c0_68 = arith.constant 0 : index
    %c0_69 = arith.constant 0 : index
    %70 = vector.load %arg9[%c0_67, %c0_68, %c0_69] : memref<2x7x14xbf16, #tpu.memory_space<vmem>>, vector<1x7x14xbf16>
    %71 = vector.shape_cast %70 : vector<1x7x14xbf16> to vector<7x14xbf16>
    %cst_70 = arith.constant dense<0.000000e+00> : vector<7x56xf32>
    %72 = tpu.matmul %71, %69, %cst_70 {dimension_numbers = #tpu.dot_dimension_numbers<[1], [0], [0], [1], [0, 0, 1, 1], [], []>} : vector<7x14xbf16>, vector<14x56xbf16>, vector<7x56xf32> -> vector<7x56xf32>
    %c1_71 = arith.constant 1 : index
    %c0_72 = arith.constant 0 : index
    %c0_73 = arith.constant 0 : index
    %73 = vector.load %arg9[%c1_71, %c0_72, %c0_73] : memref<2x7x14xbf16, #tpu.memory_space<vmem>>, vector<1x7x14xbf16>
    %74 = vector.shape_cast %73 : vector<1x7x14xbf16> to vector<7x14xbf16>
    %cst_74 = arith.constant dense<0.000000e+00> : vector<7x56xf32>
    %75 = tpu.matmul %74, %69, %cst_74 {dimension_numbers = #tpu.dot_dimension_numbers<[1], [0], [0], [1], [0, 0, 1, 1], [], []>} : vector<7x14xbf16>, vector<14x56xbf16>, vector<7x56xf32> -> vector<7x56xf32>
    %76 = arith.maximumf %72, %75 : vector<7x56xf32>
    %c0_75 = arith.constant 0 : index
    %c0_76 = arith.constant 0 : index
    %77 = vector.load %arg14[%c0_75, %c0_76] : memref<7x56xf32, #tpu.memory_space<vmem>>, vector<7x56xf32>
    tpu.vector_store %arg14[%c0_75, %c0_76], %76 {strides = array<i32>} : memref<7x56xf32, #tpu.memory_space<vmem>>, vector<7x56xf32>,
    %c0_77 = arith.constant 0 : index
    %c0_78 = arith.constant 0 : index
    %78 = vector.load %arg11[%c0_77, %c0_78] : memref<1x10xf32, #tpu.memory_space<vmem>>, vector<1x10xf32>
    %c0_79 = arith.constant 0 : index
    %c0_80 = arith.constant 0 : index
    %79 = vector.load %arg14[%c0_79, %c0_80] : memref<7x56xf32, #tpu.memory_space<vmem>>, vector<1x56xf32>
    %80 = arith.truncf %79 : vector<1x56xf32> to vector<1x56xbf16>
    %c0_81 = arith.constant 0 : index
    %c0_82 = arith.constant 0 : index
    %c0_83 = arith.constant 0 : index
    %81 = vector.load %arg10[%c0_81, %c0_82, %c0_83] : memref<7x56x10xbf16, #tpu.memory_space<vmem>>, vector<1x56x10xbf16>
    %82 = vector.shape_cast %81 : vector<1x56x10xbf16> to vector<56x10xbf16>
    %cst_84 = arith.constant dense<0.000000e+00> : vector<1x10xf32>
    %83 = tpu.matmul %80, %82, %cst_84 {dimension_numbers = #tpu.dot_dimension_numbers<[1], [0], [0], [1], [0, 0, 1, 1], [], []>} : vector<1x56xbf16>, vector<56x10xbf16>, vector<1x10xf32> -> vector<1x10xf32>
    %84 = arith.addf %78, %83 : vector<1x10xf32>
    %c1_85 = arith.constant 1 : index
    %c0_86 = arith.constant 0 : index
    %85 = vector.load %arg14[%c1_85, %c0_86] : memref<7x56xf32, #tpu.memory_space<vmem>>, vector<1x56xf32>
    %86 = arith.truncf %85 : vector<1x56xf32> to vector<1x56xbf16>
    %c1_87 = arith.constant 1 : index
    %c0_88 = arith.constant 0 : index
    %c0_89 = arith.constant 0 : index
    %87 = vector.load %arg10[%c1_87, %c0_88, %c0_89] : memref<7x56x10xbf16, #tpu.memory_space<vmem>>, vector<1x56x10xbf16>
    %88 = vector.shape_cast %87 : vector<1x56x10xbf16> to vector<56x10xbf16>
    %cst_90 = arith.constant dense<0.000000e+00> : vector<1x10xf32>
    %89 = tpu.matmul %86, %88, %cst_90 {dimension_numbers = #tpu.dot_dimension_numbers<[1], [0], [0], [1], [0, 0, 1, 1], [], []>} : vector<1x56xbf16>, vector<56x10xbf16>, vector<1x10xf32> -> vector<1x10xf32>
    %90 = arith.addf %84, %89 : vector<1x10xf32>
    %c2_91 = arith.constant 2 : index
    %c0_92 = arith.constant 0 : index
    %91 = vector.load %arg14[%c2_91, %c0_92] : memref<7x56xf32, #tpu.memory_space<vmem>>, vector<1x56xf32>
    %92 = arith.truncf %91 : vector<1x56xf32> to vector<1x56xbf16>
    %c2_93 = arith.constant 2 : index
    %c0_94 = arith.constant 0 : index
    %c0_95 = arith.constant 0 : index
    %93 = vector.load %arg10[%c2_93, %c0_94, %c0_95] : memref<7x56x10xbf16, #tpu.memory_space<vmem>>, vector<1x56x10xbf16>
    %94 = vector.shape_cast %93 : vector<1x56x10xbf16> to vector<56x10xbf16>
    %cst_96 = arith.constant dense<0.000000e+00> : vector<1x10xf32>
    %95 = tpu.matmul %92, %94, %cst_96 {dimension_numbers = #tpu.dot_dimension_numbers<[1], [0], [0], [1], [0, 0, 1, 1], [], []>} : vector<1x56xbf16>, vector<56x10xbf16>, vector<1x10xf32> -> vector<1x10xf32>
    %96 = arith.addf %90, %95 : vector<1x10xf32>
    %c3 = arith.constant 3 : index
    %c0_97 = arith.constant 0 : index
    %97 = vector.load %arg14[%c3, %c0_97] : memref<7x56xf32, #tpu.memory_space<vmem>>, vector<1x56xf32>
    %98 = arith.truncf %97 : vector<1x56xf32> to vector<1x56xbf16>
    %c3_98 = arith.constant 3 : index
    %c0_99 = arith.constant 0 : index
    %c0_100 = arith.constant 0 : index
    %99 = vector.load %arg10[%c3_98, %c0_99, %c0_100] : memref<7x56x10xbf16, #tpu.memory_space<vmem>>, vector<1x56x10xbf16>
    %100 = vector.shape_cast %99 : vector<1x56x10xbf16> to vector<56x10xbf16>
    %cst_101 = arith.constant dense<0.000000e+00> : vector<1x10xf32>
    %101 = tpu.matmul %98, %100, %cst_101 {dimension_numbers = #tpu.dot_dimension_numbers<[1], [0], [0], [1], [0, 0, 1, 1], [], []>} : vector<1x56xbf16>, vector<56x10xbf16>, vector<1x10xf32> -> vector<1x10xf32>
    %102 = arith.addf %96, %101 : vector<1x10xf32>
    %c4 = arith.constant 4 : index
    %c0_102 = arith.constant 0 : index
    %103 = vector.load %arg14[%c4, %c0_102] : memref<7x56xf32, #tpu.memory_space<vmem>>, vector<1x56xf32>
    %104 = arith.truncf %103 : vector<1x56xf32> to vector<1x56xbf16>
    %c4_103 = arith.constant 4 : index
    %c0_104 = arith.constant 0 : index
    %c0_105 = arith.constant 0 : index
    %105 = vector.load %arg10[%c4_103, %c0_104, %c0_105] : memref<7x56x10xbf16, #tpu.memory_space<vmem>>, vector<1x56x10xbf16>
    %106 = vector.shape_cast %105 : vector<1x56x10xbf16> to vector<56x10xbf16>
    %cst_106 = arith.constant dense<0.000000e+00> : vector<1x10xf32>
    %107 = tpu.matmul %104, %106, %cst_106 {dimension_numbers = #tpu.dot_dimension_numbers<[1], [0], [0], [1], [0, 0, 1, 1], [], []>} : vector<1x56xbf16>, vector<56x10xbf16>, vector<1x10xf32> -> vector<1x10xf32>
    %108 = arith.addf %102, %107 : vector<1x10xf32>
    %c5 = arith.constant 5 : index
    %c0_107 = arith.constant 0 : index
    %109 = vector.load %arg14[%c5, %c0_107] : memref<7x56xf32, #tpu.memory_space<vmem>>, vector<1x56xf32>
    %110 = arith.truncf %109 : vector<1x56xf32> to vector<1x56xbf16>
    %c5_108 = arith.constant 5 : index
    %c0_109 = arith.constant 0 : index
    %c0_110 = arith.constant 0 : index
    %111 = vector.load %arg10[%c5_108, %c0_109, %c0_110] : memref<7x56x10xbf16, #tpu.memory_space<vmem>>, vector<1x56x10xbf16>
    %112 = vector.shape_cast %111 : vector<1x56x10xbf16> to vector<56x10xbf16>
    %cst_111 = arith.constant dense<0.000000e+00> : vector<1x10xf32>
    %113 = tpu.matmul %110, %112, %cst_111 {dimension_numbers = #tpu.dot_dimension_numbers<[1], [0], [0], [1], [0, 0, 1, 1], [], []>} : vector<1x56xbf16>, vector<56x10xbf16>, vector<1x10xf32> -> vector<1x10xf32>
    %114 = arith.addf %108, %113 : vector<1x10xf32>
    %c6 = arith.constant 6 : index
    %c0_112 = arith.constant 0 : index
    %115 = vector.load %arg14[%c6, %c0_112] : memref<7x56xf32, #tpu.memory_space<vmem>>, vector<1x56xf32>
    %116 = arith.truncf %115 : vector<1x56xf32> to vector<1x56xbf16>
    %c6_113 = arith.constant 6 : index
    %c0_114 = arith.constant 0 : index
    %c0_115 = arith.constant 0 : index
    %117 = vector.load %arg10[%c6_113, %c0_114, %c0_115] : memref<7x56x10xbf16, #tpu.memory_space<vmem>>, vector<1x56x10xbf16>
    %118 = vector.shape_cast %117 : vector<1x56x10xbf16> to vector<56x10xbf16>
    %cst_116 = arith.constant dense<0.000000e+00> : vector<1x10xf32>
    %119 = tpu.matmul %116, %118, %cst_116 {dimension_numbers = #tpu.dot_dimension_numbers<[1], [0], [0], [1], [0, 0, 1, 1], [], []>} : vector<1x56xbf16>, vector<56x10xbf16>, vector<1x10xf32> -> vector<1x10xf32>
    %120 = arith.addf %114, %119 : vector<1x10xf32>
    %c0_117 = arith.constant 0 : index
    %c0_118 = arith.constant 0 : index
    %c0_119 = arith.constant 0 : index
    %121 = vector.load %arg12[%c0_117, %c0_118, %c0_119] : memref<1x1x10xf32, #tpu.memory_space<vmem>>, vector<1x1x10xf32>
    %122 = vector.shape_cast %121 : vector<1x1x10xf32> to vector<1x10xf32>
    %123 = vector.shape_cast %120 : vector<1x10xf32> to vector<1x1x10xf32>
    tpu.vector_store %arg12[%c0_117, %c0_118, %c0_119], %123 {strides = array<i32>} : memref<1x1x10xf32, #tpu.memory_space<vmem>>, vector<1x1x10xf32>,
    return
  }
  func.func @transform_0(%arg0: i32) -> (i32, i32, i32) {
    %c0_i32 = arith.constant 0 : i32
    %c0_i32_0 = arith.constant 0 : i32
    %c0_i32_1 = arith.constant 0 : i32
    return %arg0, %c0_i32, %c0_i32_0 : i32, i32, i32
  }
  func.func @transform_1(%arg0: i32) -> (i32, i32, i32) {
    %c0_i32 = arith.constant 0 : i32
    %c0_i32_0 = arith.constant 0 : i32
    %c0_i32_1 = arith.constant 0 : i32
    %c0_i32_2 = arith.constant 0 : i32
    return %c0_i32, %c0_i32_0, %c0_i32_1 : i32, i32, i32
  }
  func.func @transform_2(%arg0: i32) -> (i32, i32) {
    %c0_i32 = arith.constant 0 : i32
    %c0_i32_0 = arith.constant 0 : i32
    %c0_i32_1 = arith.constant 0 : i32
    return %c0_i32, %c0_i32_0 : i32, i32
  }
  func.func @transform_3(%arg0: i32) -> (i32, i32, i32) {
    %c0_i32 = arith.constant 0 : i32
    %c0_i32_0 = arith.constant 0 : i32
    %c0_i32_1 = arith.constant 0 : i32
    %c0_i32_2 = arith.constant 0 : i32
    return %c0_i32, %c0_i32_0, %c0_i32_1 : i32, i32, i32
  }
  func.func @transform_4(%arg0: i32) -> (i32, i32, i32) {
    %c0_i32 = arith.constant 0 : i32
    %c0_i32_0 = arith.constant 0 : i32
    %c0_i32_1 = arith.constant 0 : i32
    %c0_i32_2 = arith.constant 0 : i32
    return %c0_i32, %c0_i32_0, %c0_i32_1 : i32, i32, i32
  }
  func.func @transform_5(%arg0: i32) -> (i32, i32, i32) {
    %c0_i32 = arith.constant 0 : i32
    %c0_i32_0 = arith.constant 0 : i32
    %c0_i32_1 = arith.constant 0 : i32
    %c0_i32_2 = arith.constant 0 : i32
    return %c0_i32, %c0_i32_0, %c0_i32_1 : i32, i32, i32
  }
  func.func @transform_6(%arg0: i32) -> (i32, i32) {
    %c0_i32 = arith.constant 0 : i32
    %c0_i32_0 = arith.constant 0 : i32
    %c0_i32_1 = arith.constant 0 : i32
    return %c0_i32, %c0_i32_0 : i32, i32
  }
  func.func @transform_7(%arg0: i32) -> (i32, i32, i32) {
    %c0_i32 = arith.constant 0 : i32
    %c0_i32_0 = arith.constant 0 : i32
    %c0_i32_1 = arith.constant 0 : i32
    %c0_i32_2 = arith.constant 0 : i32
    return %c0_i32, %c0_i32_0, %c0_i32_1 : i32, i32, i32
  }
  func.func @transform_8(%arg0: i32) -> (i32, i32, i32) {
    %c0_i32 = arith.constant 0 : i32
    %c0_i32_0 = arith.constant 0 : i32
    %c0_i32_1 = arith.constant 0 : i32
    %c0_i32_2 = arith.constant 0 : i32
    return %c0_i32, %c0_i32_0, %c0_i32_1 : i32, i32, i32
  }
  func.func @transform_9(%arg0: i32) -> (i32, i32, i32) {
    %c0_i32 = arith.constant 0 : i32
    %c0_i32_0 = arith.constant 0 : i32
    %c0_i32_1 = arith.constant 0 : i32
    %c0_i32_2 = arith.constant 0 : i32
    return %c0_i32, %c0_i32_0, %c0_i32_1 : i32, i32, i32
  }
  func.func @transform_10(%arg0: i32) -> (i32, i32) {
    %c0_i32 = arith.constant 0 : i32
    %c0_i32_0 = arith.constant 0 : i32
    %c0_i32_1 = arith.constant 0 : i32
    return %c0_i32, %c0_i32_0 : i32, i32
  }
  func.func @transform_11(%arg0: i32) -> (i32, i32, i32) {
    %c0_i32 = arith.constant 0 : i32
    %c0_i32_0 = arith.constant 0 : i32
    %c0_i32_1 = arith.constant 0 : i32
    return %arg0, %c0_i32, %c0_i32_0 : i32, i32, i32
  }
}

</mosaic_0001>

<bundles_post_ra>
// kernel: forward.1
= control target key start
LH: loop header
LB: loop body
LE: loop exit
PB: predicated region body
PF: predicated region fallthrough
CT: control target
= control target key end

     0   :  { %16 = vsyncpa [#allocation5], 0  ;;  %s4260_s0 = inlined_call_operand.vmem [shape: bf16[2,30,90], index: 0, kind: input, shape index: {}]   ;;  %s4261_s1 = inlined_call_operand.vmem [shape: bf16[3,90,224], index: 1, kind: input, shape index: {}]   ;;  %s4262_s2 = inlined_call_operand.vmem [shape: f32[1,224], index: 2, kind: input, shape index: {}]   ;;  %s4263_s3 = inlined_call_operand.vmem [shape: bf16[2,224,128], index: 3, kind: input, shape index: {}]   ;;  %s4264_s4 = inlined_call_operand.vmem [shape: bf16[2,16,28], index: 4, kind: input, shape index: {}]   ;;  %s4265_s5 = inlined_call_operand.vmem [shape: bf16[3,128,112], index: 5, kind: input, shape index: {}]   ;;  %s4266_s6 = inlined_call_operand.vmem [shape: f32[1,112], index: 6, kind: input, shape index: {}]   ;;  %s4267_s7 = inlined_call_operand.vmem [shape: bf16[2,112,56], index: 7, kind: input, shape index: {}]   ;;  %s4268_s8 = inlined_call_operand.vmem [shape: bf16[2,7,14], index: 8, kind: input, shape index: {}]   ;;  %s4269_s9 = inlined_call_operand.vmem [shape: bf16[7,56,10], index: 9, kind: input, shape index: {}]   ;;  %s4270_s10 = inlined_call_operand.vmem [shape: f32[1,10], index: 10, kind: input, shape index: {}]   ;;  %s4271_s11 = inlined_call_operand.hbm [shape: f32[2,1,10], index: 11, kind: output, shape index: {}]  }
   0x1   :  { %18 = vsyncpa [#allocation5 + $0x1], 0  ;;  %s3557_s17 = smov 0   ;;  %s3559_s18 = smov 0  }
   0x2   :  { %s3561_s19 = smov 0   ;;  %s3563_s20 = smov 0  }
   0x3 LB: > { %4273 = sst [smem:[#allocation7_spill]] %s3487_s19  ;;  %s3578_s21 = sadd.s32 4294967295, %s3491_s20   ;;  %s3491_s20 = sphi %s3563_s20, %s4282_s20   ;;  %s3487_s19 = sphi %s3561_s19, %s4281_s19   ;;  %s3483_s18 = sphi %s3559_s18, %s4280_s18   ;;  %s3479_s17 = sphi %s3557_s17, %s4279_s17  }
   0x4   : > { %s2580_s22 = sadd.s32 4294967294, %s3491_s20   ;;  %s3582_s23 = sadd.s32 1, %s3491_s20  }
   0x5   : > { %s267_s24 = sadd.s32 1, %s3487_s19  ;;  %s264_s25 = ssub.s32 %s3491_s20, %s3582_s23 }
   0x6   : > { %p277_p0 = scmp.ne.s32.totalorder %s3487_s19, %s3483_s18  ;;  %p265_p1 = scmp.eq.s32.totalorder %s264_s25, 0 }
   0x7   : > { %p278_p2 = scmp.eq.s32.totalorder %s3578_s21, 1  ;;  %p283_p3 = scmp.ne.s32.totalorder %s3483_s18, %s3479_s17 }
   0x8   : > { %p284_p4 = scmp.eq.s32.totalorder %s2580_s22, 1  ;;  %p2583_p7 = scmp.ge.s32.totalorder %s3491_s20, 1 }
   0x9   : > { %s3593_s26 = scalar_select %p265_p1, %s3487_s19, %s267_s24  }
   0xa   : > { %p3595_p5 = por %p278_p2, %p277_p0  ;;  %p3599_p6 = por %p284_p4, %p283_p3 }
   0xb   : > { %4274 = sst [smem:[#allocation8_spill]] %s3593_s26  ;;  %p340_p8 = scmp.lt.s32.totalorder %s3491_s20, 3 }
   0xd   : > { %p341_p9 = pnand %p2583_p7, %p340_p8 }
   0xe   : > { %v3275_v0 = vld [vmem:[%s4261_s1 + $0x4] ss:$8 sps:$4 sm:$0xff] (!%p341_p9)   ;;  %v3277_v1 = vld [vmem:[%s4261_s1] ss:$8 sps:$4 sm:$0xff] (!%p341_p9)   ;;  %v3493_v2 = vmov (!%p341_p9), 0   ;;  %p379_p10 = scmp.lt.s32.totalorder (!%p341_p9), %s3578_s21, 1 }
   0xf   : > { %344 = sbr.rel (%p341_p9) target bundleno = 1842 (0x732), region = 64  ;;  %670 = vmatprep.mubr.bf16.mxu0 (!%p341_p9), %v3493_v2  ;;  %545 = vmatprep.mubr.bf16.mxu1 (!%p341_p9), %v3493_v2  ;;  %v3278_v3 = vld [vmem:[%s4261_s1 + $0x14] ss:$8 sps:$4 sm:$0xff] (!%p341_p9)   ;;  %v3280_v4 = vld [vmem:[%s4261_s1 + $0x10] ss:$8 sps:$4 sm:$0xff] (!%p341_p9)   ;;  %vm506_vm0 = vcmask (!%p341_p9), 1044480  }
  0x10   : > { %638 = vmatprep.subr.bf16.mxu0 (!%p341_p9), %v3275_v0  ;;  %v3281_v5 = vld [vmem:[%s4261_s1 + $0x24] ss:$8 sps:$4 sm:$0xff] (!%p341_p9)   ;;  %v3283_v6 = vld [vmem:[%s4261_s1 + $0x20] ss:$8 sps:$4 sm:$0xff] (!%p341_p9)   ;;  %v3284_v7 = vld [vmem:[%s4261_s1 + $0x34] ss:$8 sps:$4 sm:$0xff] (!%p341_p9)  }
  0x11   : > { %639 = vmatpush1.bf16.msra.mxu0 (!%p341_p9), %v3277_v1  ;;  %v3292_v8 = vld [vmem:[%s4261_s1 + $0x64] ss:$8 sps:$4 sm:$0xff] (!%p341_p9)   ;;  %v3295_v9 = vld [vmem:[%s4261_s1 + $0x60] ss:$8 sps:$4 sm:$0xff] (!%p341_p9)   ;;  %v3286_v10 = vld [vmem:[%s4261_s1 + $0x30] ss:$8 sps:$4 sm:$0xff] (!%p341_p9)  }
  0x12   : > { %640 = vmatprep.subr.bf16.mxu0 (!%p341_p9), %v3278_v3  ;;  %513 = vmatprep.subr.bf16.mxu1 (!%p341_p9), %v3292_v8  ;;  %v3299_v11 = vld [vmem:[%s4261_s1 + $0x74] ss:$8 sps:$4 sm:$0xff] (!%p341_p9)   ;;  %v3287_v12 = vld [vmem:[%s4261_s1 + $0x44] ss:$8 sps:$4 sm:$0xff] (!%p341_p9)   ;;  %v3303_v13 = vld [vmem:[%s4261_s1 + $0x70] ss:$8 sps:$4 sm:$0xff] (!%p341_p9)  }
  0x13   : > { %514 = vmatpush1.bf16.msra.mxu1 (!%p341_p9), %v3295_v9  ;;  %v3289_v14 = vld [vmem:[%s4261_s1 + $0x40] ss:$8 sps:$4 sm:$0xff] (!%p341_p9)   ;;  %v3290_v16 = vld [vmem:[%s4261_s1 + $0x54] ss:$8 sps:$4 sm:$0x1f] (!%p341_p9)   ;;  %vm499_vm2 = vcmask (!%p341_p9), 736256  }
  0x14   : > { %515 = vmatprep.subr.bf16.mxu1 (!%p341_p9), %v3299_v11  ;;  %v3307_v18 = vld [vmem:[%s4261_s1 + $0x84] ss:$8 sps:$4 sm:$0xff] (!%p341_p9)   ;;  %v3309_v19 = vld [vmem:[%s4261_s1 + $0x80] ss:$8 sps:$4 sm:$0xff] (!%p341_p9)   ;;  %v3313_v22 = vld [vmem:[%s4261_s1 + $0x94] ss:$8 sps:$4 sm:$0xff] (!%p341_p9)  }
  0x15   : > { %641 = vmatpush1.bf16.msra.mxu0 (!%p341_p9), %v3280_v4  ;;  %v3294_v20 = vld [vmem:[%s4261_s1 + $0x50] ss:$8 sps:$4 sm:$0x1f] (!%p341_p9)   ;;  %v3298_v26 = vld [vmem:[%s4261_s1 + $0xc4] ss:$8 sps:$4 sm:$0xff] (!%p341_p9)   ;;  %vm708_vm3 = vcmask (!%p341_p9), 1046528  }
  0x16   : > { %s380_s24 = scalar_select %p379_p10, %s3578_s21, 1  ;;  %642 = vmatprep.subr.bf16.mxu0 %v3281_v5  ;;  %v3315_v23 = vld [vmem:[%s4261_s1 + $0x90] ss:$8 sps:$4 sm:$0xff]   ;;  %v633_v25 = vsel %vm506_vm0, %v3294_v20, 0  ;;  %v3319_v27 = vld [vmem:[%s4261_s1 + $0xa4] ss:$8 sps:$4 sm:$0xff]  }
  0x17   : > { %516 = vmatpush1.bf16.msra.mxu1 %v3303_v13  ;;  %vm425_vm1 = vsmask.f32 7424  ;;  %v3296_v30 = vld [vmem:[%s4261_s1 + $0xc0] ss:$8 sps:$4 sm:$0xff]   ;;  %v3306_v35 = vld [vmem:[%s4261_s1 + $0xd4] ss:$8 sps:$4 sm:$0xff]  }
  0x18   : > { %s2895_s13 = sshll.u32 %s380_s24, 4  ;;  %517 = vmatprep.subr.bf16.mxu1 %v3307_v18  ;;  %v3321_v33 = vld [vmem:[%s4261_s1 + $0xa0] ss:$8 sps:$4 sm:$0xff]   ;;  %v3329_v36 = vld [vmem:[%s4261_s1 + $0xb0] ss:$8 sps:$4 sm:$0x1f]  }
  0x19   : > { %s3639_s30 = scalar_lea.vmem %s4260_s0, %s2895_s13  ;;  %643 = vmatpush1.bf16.msra.mxu0 %v3283_v6  ;;  %v3327_v37 = vld [vmem:[%s4261_s1 + $0xb4] ss:$8 sps:$4 sm:$0x1f]   ;;  %v3304_v38 = vld [vmem:[%s4261_s1 + $0xd0] ss:$8 sps:$4 sm:$0xff]   ;;  %v508_v43 = vsel %vm506_vm0, %v3329_v36, 0 }
  0x1a   : > { %644 = vmatprep.subr.bf16.mxu0 %v3284_v7  ;;  %v385_v15 = vld [vmem:[%s3639_s30] sm:$0xf]  ;;  %v3661_v17 = vld [vmem:[%s3639_s30 + $0x4] sm:$0xf]  ;;  %v387_v28 = vld [vmem:[%s3639_s30 + $0x8] sm:$0xf] }
  0x1b   : > { %v2598_v21 = vcombine.low %v385_v15, %v3661_v17  ;;  %518 = vmatpush1.bf16.msra.mxu1 %v3309_v19  ;;  %v401_v29 = vld [vmem:[%s3639_s30 + $0xc] sm:$0x7]  ;;  %v691_v45 = vld [vmem:[%s3639_s30] sm:$0xe]  ;;  %v3318_v51 = vld [vmem:[%s4261_s1 + $0xf4] ss:$8 sps:$4 sm:$0xff]  }
  0x1c   : > { %519 = vmatprep.subr.bf16.mxu1 %v3313_v22  ;;  %v3692_v31 = vcombine.low %v387_v28, %v401_v29  ;;  %v3312_v39 = vld [vmem:[%s4261_s1 + $0xe4] ss:$8 sps:$4 sm:$0xff]   ;;  %v3310_v47 = vld [vmem:[%s4261_s1 + $0xe0] ss:$8 sps:$4 sm:$0xff]   ;;  %v2643_v50 = vcombine.low %v691_v45, %v3661_v17  ;;  %v3316_v52 = vld [vmem:[%s4261_s1 + $0xf0] ss:$8 sps:$4 sm:$0xff]   ;;  %v845_v17 = vlaneseq }
  0x1d   : > { %645 = vmatpush1.bf16.msra.mxu0 %v3286_v10  ;;  %v429_v24 = vshll.u32 %v2598_v21, 16  ;;  %v427_v32 = vshrl.u32 %v2598_v21, 16  ;;  %v388_v41 = vld [vmem:[%s3639_s30 + $0xc] sm:$0x3]  ;;  %v3333_v53 = vld [vmem:[%s4263_s3] sm:$0xff]   ;;  %v3335_v63 = vld [vmem:[%s4263_s3 + $0x10] sm:$0xff]  }
  0x1e   : > { %646 = vmatprep.subr.bf16.mxu0 %v3287_v12  ;;  %v434_v40 = vshll.u32 %v3692_v31, 16  ;;  %v2615_v46 = vcombine.low %v387_v28, %v388_v41  ;;  %v3332_v49 = vld [vmem:[%s4261_s1 + $0x110] ss:$8 sps:$4 sm:$0x1f]   ;;  %v438_v54 = vshrl.u32 %v3692_v31, 16  ;;  %v709_v56 = vrot.slane %v2643_v50, 1 }
  0x1f   : > { %520 = vmatpush1.bf16.msra.mxu1 %v3315_v23  ;;  %v431_v34 = vrot.slane %v429_v24, 1  ;;  %v3326_v55 = vld [vmem:[%s4261_s1 + $0x104] ss:$8 sps:$4 sm:$0xff]   ;;  %v710_v57 = vrot.slane %v3692_v31, 1  ;;  %v3324_v58 = vld [vmem:[%s4261_s1 + $0x100] ss:$8 sps:$4 sm:$0xff]  }
  0x20   : > { %521 = vmatprep.subr.bf16.mxu1 %v3319_v27  ;;  %v436_v44 = vrot.slane %v434_v40, 1  ;;  %v777_v59 = vsel %vm506_vm0, %v3332_v49, 0  ;;  %v3334_v60 = vld [vmem:[%s4263_s3 + $0x8] sm:$0xff]   ;;  %v3330_v61 = vld [vmem:[%s4261_s1 + $0x114] ss:$8 sps:$4 sm:$0x1f]  }
  0x21   : > { %647 = vmatpush1.bf16.msra.mxu0 %v3289_v14  ;;  %v432_v42 = vor.u32 %v431_v34, %v427_v32  ;;  %v3336_v0 = vld [vmem:[%s4263_s3 + $0x18] sm:$0xff]   ;;  %v711_v1 = vsel %vm708_vm3, %v709_v56, %v710_v57  ;;  %v3337_v3 = vld [vmem:[%s4263_s3 + $0x20] sm:$0xff]   ;;  %v3338_v4 = vld [vmem:[%s4263_s3 + $0x28] sm:$0xff]   ;;  %v846_v18 = vshrl.u32 %v845_v17, 7  ;;  %vm987_vm4 = vcmask 785408   ;;  %s377_s15 = sand.u32 1, %s3483_s18  }
  0x22   : > { %2628 = vmatprep.subr.msk.bf16.mxu0 %vm506_vm0, %v3290_v16  ;;  %v440_v62 = vor.u32 %v438_v54, %v436_v44  ;;  %v3339_v5 = vld [vmem:[%s4263_s3 + $0x30] sm:$0xff]   ;;  %v3340_v6 = vld [vmem:[%s4263_s3 + $0x38] sm:$0xff]   ;;  %v3341_v7 = vld [vmem:[%s4263_s3 + $0x40] sm:$0xff]   ;;  %vm3495_vm5 = vmmov 0   ;;  %vm1222_vm6 = vcmask 1045504   ;;  %vm1218_vm7 = vcmask 228352  }
  0x23   : > { %522 = vmatpush1.bf16.msra.mxu1 %v3321_v33  ;;  %v437_v48 = vsel %vm425_vm1, %v432_v42, %v436_v44  ;;  %v3342_v8 = vld [vmem:[%s4263_s3 + $0x48] sm:$0xff]   ;;  %v3343_v9 = vld [vmem:[%s4263_s3 + $0x50] sm:$0xff]   ;;  %v3344_v10 = vld [vmem:[%s4263_s3 + $0x58] sm:$0xff]   ;;  %v847_v22 = vsub.s32 0, %v846_v18  ;;  %vm1719_vm8 = vcmask 916480   ;;  %vm1866_vm9 = vcmask 113664  }
  0x24   : > { %2612 = vmatprep.subr.msk.bf16.mxu1 %vm506_vm0, %v3327_v37  ;;  %v3345_v11 = vld [vmem:[%s4263_s3 + $0x60] sm:$0xff]   ;;  %v3346_v12 = vld [vmem:[%s4263_s3 + $0x68] sm:$0xff]   ;;  %v3367_v17 = vld [vmem:[%s4265_s5 + $0x50] sm:$0xff]   ;;  %vm1997_vm10 = vcmask 1043456   ;;  %vm1960_vm11 = vcmask 456704   ;;  %vm1993_vm12 = vcmask 457728  }
  0x25   : > { %649 = vmatpush1.bf16.msra.mxu0 %v633_v25  ;;  %v843_v24 = vld [vmem:[%s4262_s2] sm:$0x3]  ;;  %v851_v25 = vsub.s32 1, %v846_v18  ;;  %s2892_s22 = sshll.u32 %s3578_s21, 4  ;;  %s378_s25 = scalar_lea.vmem [#allocation4], %s377_s15  ;;  %vm2510_vm13 = vcmask 73728  }
  0x26   : > { %782 = vmatprep.subr.bf16.mxu0 %v3298_v26  ;;  %v848_v26 = vrot.slane %v843_v24, %v847_v22  ;;  %s2525_s29 = sshll.u32 %s378_s25, 4  ;;  %s4218_s12 = scalar_lea.hbm %s4271_s11, %s2892_s22  ;;  %s4220_s29 = int_to_ptr.vmem [resolvable:$true] %s2525_s29 }
  0x27   : > { %524 = vmatpush1.bf16.msra.mxu1 %v508_v43  ;;  %v852_v28 = vrot.slane %v843_v24, %v851_v25  ;;  %s2513_s21 = scalar_lea.sflag [#allocation5], %s377_s15  ;;  %s3429_s26 = scalar_lea.vmem %s4220_s29, 16 }
  0x28   : > { %2629 = vmatmul.mubr.msk.bf16.vlgmr.msra.gmra.mrb[0].mxu0 %vm499_vm2, %v2598_v21  ;;  %994 = vmatprep.subr.bf16.mxu1 %v3493_v2  ;;  %p3430_p11 = scmp.ne.s32.totalorder %s4220_s29, %s3429_s26  ;;  %s3496_s14 = smov [#allocation4]  }
  0x29   : > { %783 = vmatpush1.bf16.msra.mxu0 %v3296_v30  ;;  %680 = vmatprep.mubr.bf16.mxu0 %v3493_v2  ;;  %s3433_s19 = sshll.u32 %s3496_s14, 4  ;;  %s3434_s19 = int_to_ptr.vmem [resolvable:$false] %s3433_s19 }
  0x2a   : > { %784 = vmatprep.subr.bf16.mxu0 %v3306_v35  ;;  %2613 = vmatmul.mubr.msk.bf16.vlgmr.msra.gmra.mrb[0].mxu1 %vm499_vm2, %v437_v48  ;;  %p3431_p12 = pnand %p3430_p11, %p3595_p5  ;;  %s3435_s16 = scalar_lea.vmem %s3434_s19, 32 }
  0x2b   : > { %555 = vmatprep.mubr.bf16.mxu1 %v3493_v2  ;;  %995 = vmatpush1.bf16.msra.mxu1 %v3333_v53  ;;  %p3436_p0 = scmp.lt.s32.totalorder %s4220_s29, %s3434_s19  ;;  %p3437_p1 = scmp.lt.s32.totalorder %s3435_s16, %s3429_s26 }
  0x2c   : > { %996 = vmatprep.subr.bf16.mxu1 %v3493_v2  ;;  %p3432_p13 = pneg %p3431_p12 }
  0x2d   : > { %785 = vmatpush1.bf16.msra.mxu0 %v3304_v38  ;;  %p3438_p2 = por %p3437_p1, %p3436_p0 }
  0x2e   : > { %786 = vmatprep.subr.bf16.mxu0 %v3312_v39 }
  0x2f   : > { %997 = vmatpush1.bf16.msra.mxu1 %v3334_v60  ;;  %p3439_p3 = pnand %p3438_p2, %p3432_p13 }
  0x30   : > { %2630 = vmatmul.mubr.msk.bf16.gmra.mrb[4].mxu0 %vm499_vm2, %v2615_v46  ;;  %998 = vmatprep.subr.bf16.mxu1 %v3493_v2 }
  0x31   : > { %787 = vmatpush1.bf16.msra.mxu0 %v3310_v47  ;;  %814 = vmatprep.mubr.bf16.mxu0 %v3493_v2 }
  0x32   : > { %788 = vmatprep.subr.bf16.mxu0 %v3318_v51  ;;  %2614 = vmatmul.mubr.msk.bf16.gmra.mrb[4].mxu1 %vm499_vm2, %v440_v62  ;;  %v3347_v51 = vld [vmem:[%s4263_s3 + $0x70] sm:$0xff]  }
  0x33   : > { %999 = vmatpush1.bf16.msra.mxu1 %v3335_v63 }
  0x34   : > { %1000 = vmatprep.subr.bf16.mxu1 %v3493_v2 }
  0x35   : > { %789 = vmatpush1.bf16.msra.mxu0 %v3316_v52 }
  0x36   : > { %790 = vmatprep.subr.bf16.mxu0 %v3326_v55 }
  0x37   : > { %1001 = vmatpush1.bf16.msra.mxu1 %v3336_v0 }
  0x38   : > { %1002 = vmatprep.subr.bf16.mxu1 %v3493_v2 }
  0x39   : > { %791 = vmatpush1.bf16.msra.mxu0 %v3324_v58 }
  0x3a   : > { %2656 = vmatprep.subr.msk.bf16.mxu0 %vm506_vm0, %v3330_v61 }
  0x3b   : > { %1003 = vmatpush1.bf16.msra.mxu1 %v3337_v3  ;;  %v3349_v3 = vld [vmem:[%s4263_s3 + $0x80] sm:$0xff]  }
  0x3c   : > { %1004 = vmatprep.subr.bf16.mxu1 %v3493_v2 }
  0x3d   : > { %793 = vmatpush1.bf16.msra.mxu0 %v777_v59  ;;  %v3348_v59 = vld [vmem:[%s4263_s3 + $0x78] sm:$0xff]  }
  0x3f   : > { %1005 = vmatpush1.bf16.msra.mxu1 %v3338_v4  ;;  %v3350_v4 = vld [vmem:[%s4263_s3 + $0x88] sm:$0xff]  }
  0x40   : > { %2657 = vmatmul.mubr.msk.bf16.vlgmr.msra.gmra.mrb[0].mxu0 %vm499_vm2, %v711_v1  ;;  %1006 = vmatprep.subr.bf16.mxu1 %v3493_v2 }
  0x41   : > { %824 = vmatprep.mubr.bf16.mxu0 %v3493_v2 }
  0x43   : > { %1007 = vmatpush1.bf16.msra.mxu1 %v3339_v5  ;;  %v3351_v5 = vld [vmem:[%s4263_s3 + $0x90] sm:$0xff]  }
  0x44   : > { %1008 = vmatprep.subr.bf16.mxu1 %v3493_v2 }
  0x47   : > { %1009 = vmatpush1.bf16.msra.mxu1 %v3340_v6  ;;  %v3352_v6 = vld [vmem:[%s4263_s3 + $0x98] sm:$0xff]  }
  0x48   : > { %2658 = vmatmul.mubr.msk.bf16.gmra.mrb[4].mxu0 %vm499_vm2, %v710_v57  ;;  %1010 = vmatprep.subr.bf16.mxu1 %v3493_v2 }
  0x4b   : > { %1011 = vmatpush1.bf16.msra.mxu1 %v3341_v7  ;;  %v3353_v7 = vld [vmem:[%s4263_s3 + $0xa0] sm:$0xff]  }
  0x4c   : > { %1012 = vmatprep.subr.bf16.mxu1 %v3493_v2 }
  0x4f   : > { %1013 = vmatpush1.bf16.msra.mxu1 %v3342_v8  ;;  %v3354_v8 = vld [vmem:[%s4263_s3 + $0xa8] sm:$0xff]  }
  0x50   : > { %1014 = vmatprep.subr.bf16.mxu1 %v3493_v2 }
  0x53   : > { %1015 = vmatpush1.bf16.msra.mxu1 %v3343_v9  ;;  %v3355_v9 = vld [vmem:[%s4263_s3 + $0xb0] sm:$0xff]  }
  0x54   : > { %1016 = vmatprep.subr.bf16.mxu1 %v3493_v2 }
  0x57   : > { %1017 = vmatpush1.bf16.msra.mxu1 %v3344_v10  ;;  %v3356_v10 = vld [vmem:[%s4263_s3 + $0xb8] sm:$0xff]  }
  0x58   : > { %1018 = vmatprep.subr.bf16.mxu1 %v3493_v2 }
  0x5b   : > { %1019 = vmatpush1.bf16.msra.mxu1 %v3345_v11  ;;  %v3357_v11 = vld [vmem:[%s4263_s3 + $0xc0] sm:$0xff]  }
  0x5c   : > { %1020 = vmatprep.subr.bf16.mxu1 %v3493_v2 }
  0x5f   : > { %1021 = vmatpush1.bf16.msra.mxu1 %v3346_v12  ;;  %v3358_v12 = vld [vmem:[%s4263_s3 + $0xc8] sm:$0xff]  }
  0x60   : > { %1156 = vmatprep.subr.bf16.mxu1 %v3493_v2 }
  0xfd   : > { %v547_v13 = vpop.f32.mrb[0].mxu1 }
  0xfe   : > { %v549_v14 = vpop.f32.mrb[1].mxu1 }
  0xff   : > { %v551_v15 = vpop.f32.mrb[2].mxu1 }
 0x100   : > { %v553_v16 = vpop.f32.mrb[3].mxu1 }
 0x105   : > { %v557_v19 = vpop.f32.mrb[4].mxu1 }
 0x106   : > { %v559_v20 = vpop.f32.mrb[5].mxu1 }
 0x107   : > { %v561_v21 = vpop.f32.mrb[6].mxu1 }
 0x108   : > { %v563_v23 = vpop.f32.mrb[7].mxu1 }
 0x113   : > { %v816_v27 = vpop.f32.mrb[0].mxu0 }
 0x114   : > { %v3192_v29 = vadd.f32 %v816_v27, %v547_v13  ;;  %v818_v30 = vpop.f32.mrb[1].mxu0  ;;  %v3359_v13 = vld [vmem:[%s4263_s3 + $0xd0] sm:$0xff]  }
 0x115   : > { %v3193_v31 = vadd.f32 %v818_v30, %v549_v14  ;;  %v820_v32 = vpop.f32.mrb[2].mxu0  ;;  %v3360_v14 = vld [vmem:[%s4263_s3 + $0xd8] sm:$0xff]  }
 0x116   : > { %v855_v33 = vadd.f32 %v3192_v29, %v848_v26  ;;  %v3194_v34 = vadd.f32 %v820_v32, %v551_v15  ;;  %v822_v35 = vpop.f32.mrb[3].mxu0  ;;  %v3494_v15 = vmov 0.0  }
 0x117   : > { %v856_v36 = vadd.f32 %v3193_v31, %v852_v28  ;;  %v3195_v37 = vadd.f32 %v822_v35, %v553_v16  ;;  %2984 = vmatprep.subr.bf16.mxu0 %v3494_v15  ;;  %2988 = vmatprep.mubr.msk.bf16.mxu0 %vm3495_vm5, %v3494_v15  ;;  %v3365_v16 = vld [vmem:[%s4265_s5 + $0x48] sm:$0xff]  }
 0x118   : > { %v857_v38 = vadd.f32 %v3194_v34, %v848_v26  ;;  %v863_v40 = vmax.f32 %v855_v33, 0.0 }
 0x119   : > { %v858_v39 = vadd.f32 %v3195_v37, %v852_v28  ;;  %v864_v42 = vmax.f32 %v856_v36, 0.0 }
 0x11a   : > { %v865_v41 = vmax.f32 %v857_v38, 0.0 }
 0x11b   : > { %v866_v43 = vmax.f32 %v858_v39, 0.0  ;;  %v826_v44 = vpop.f32.mrb[4].mxu0 }
 0x11c   : > { %v3815_v45 = vpack.c.bf16 %v865_v41, %v863_v40  ;;  %v3196_v46 = vadd.f32 %v826_v44, %v557_v19  ;;  %v828_v47 = vpop.f32.mrb[5].mxu0  ;;  %v3361_v41 = vld [vmem:[%s4264_s4] sm:$0xff]   ;;  %v3366_v44 = vld [vmem:[%s4265_s5 + $0x88] sm:$0xff]  }
 0x11d   : > { %v872_v48 = vpack.c.bf16 %v866_v43, %v864_v42  ;;  %v3197_v49 = vadd.f32 %v828_v47, %v559_v20  ;;  %v830_v50 = vpop.f32.mrb[6].mxu0  ;;  %v3362_v42 = vld [vmem:[%s4264_s4 + $0x8] sm:$0xff]   ;;  %v3364_v43 = vld [vmem:[%s4265_s5 + $0x80] sm:$0xff]   ;;  %v3370_v47 = vld [vmem:[%s4265_s5 + $0x98] sm:$0xff]  }
 0x11e   : > { %v859_v52 = vadd.f32 %v3196_v46, %v848_v26  ;;  %v3198_v53 = vadd.f32 %v830_v50, %v561_v21  ;;  %v832_v54 = vpop.f32.mrb[7].mxu0  ;;  %v3369_v46 = vld [vmem:[%s4265_s5 + $0x58] sm:$0xff]   ;;  %v3373_v50 = vld [vmem:[%s4265_s5 + $0x68] sm:$0xff]  }
 0x11f   : > { %v860_v55 = vadd.f32 %v3197_v49, %v852_v28  ;;  %v3199_v56 = vadd.f32 %v832_v54, %v563_v23  ;;  %2673 = vmatprep.mubr.msk.bf16.mxu1 %vm987_vm4, %v872_v48  ;;  %v3372_v49 = vld [vmem:[%s4265_s5 + $0xa0] sm:$0xff]   ;;  %v3377_v54 = vld [vmem:[%s4265_s5 + $0x78] sm:$0xff]  }
 0x120   : > { %v861_v57 = vadd.f32 %v3198_v53, %v848_v26  ;;  %1027 = vmatmul.mubr.bf16.vlgmr.msra.gmra.mrb[8].mxu1 %v3815_v45  ;;  %v867_v60 = vmax.f32 %v859_v52, 0.0  ;;  %v3375_v52 = vld [vmem:[%s4265_s5 + $0x70] sm:$0xff]  }
 0x121   : > { %v862_v58 = vadd.f32 %v3199_v56, %v852_v28  ;;  %1157 = vmatpush1.bf16.msra.mxu1 %v3347_v51  ;;  %v868_v62 = vmax.f32 %v860_v55, 0.0  ;;  %v3374_v51 = vld [vmem:[%s4265_s5 + $0xa8] sm:$0xff]   ;;  %v3376_v53 = vld [vmem:[%s4265_s5 + $0xb0] sm:$0xff]   ;;  %v3378_v55 = vld [vmem:[%s4265_s5 + $0xb8] sm:$0xff]  }
 0x122   : > { %v869_v61 = vmax.f32 %v861_v57, 0.0  ;;  %1158 = vmatprep.subr.bf16.mxu1 %v3493_v2 }
 0x123   : > { %v870_v63 = vmax.f32 %v862_v58, 0.0 }
 0x124   : > { %v873_v0 = vpack.c.bf16 %v869_v61, %v867_v60 }
 0x125   : > { %v874_v1 = vpack.c.bf16 %v870_v63, %v868_v62  ;;  %1159 = vmatpush1.bf16.msra.mxu1 %v3348_v59 }
 0x126   : > { %1160 = vmatprep.subr.bf16.mxu1 %v3493_v2 }
 0x127   : > { %2674 = vmatprep.mubr.msk.bf16.mxu1 %vm987_vm4, %v874_v1 }
 0x128   : > { %1035 = vmatmul.mubr.bf16.gmra.mrb[12].mxu1 %v873_v0 }
 0x129   : > { %1161 = vmatpush1.bf16.msra.mxu1 %v3349_v3  ;;  %2717 = vmatprep.mubr.msk.bf16.mxu1 %vm987_vm4, %v872_v48  ;;  %v3371_v48 = vld [vmem:[%s4265_s5 + $0x60] sm:$0xff]  }
 0x12a   : > { %1162 = vmatprep.subr.bf16.mxu1 %v3493_v2  ;;  %v3379_v3 = vld [vmem:[%s4265_s5] sm:$0xff]  }
 0x12d   : > { %1163 = vmatpush1.bf16.msra.mxu1 %v3350_v4 }
 0x12e   : > { %1164 = vmatprep.subr.bf16.mxu1 %v3493_v2 }
 0x131   : > { %1165 = vmatpush1.bf16.msra.mxu1 %v3351_v5 }
 0x132   : > { %1166 = vmatprep.subr.bf16.mxu1 %v3493_v2 }
 0x135   : > { %1167 = vmatpush1.bf16.msra.mxu1 %v3352_v6 }
 0x136   : > { %1168 = vmatprep.subr.bf16.mxu1 %v3493_v2 }
 0x139   : > { %1169 = vmatpush1.bf16.msra.mxu1 %v3353_v7 }
 0x13a   : > { %1170 = vmatprep.subr.bf16.mxu1 %v3493_v2 }
 0x13d   : > { %1171 = vmatpush1.bf16.msra.mxu1 %v3354_v8 }
 0x13e   : > { %1172 = vmatprep.subr.bf16.mxu1 %v3493_v2 }
 0x141   : > { %1173 = vmatpush1.bf16.msra.mxu1 %v3355_v9 }
 0x142   : > { %1174 = vmatprep.subr.bf16.mxu1 %v3493_v2 }
 0x145   : > { %1175 = vmatpush1.bf16.msra.mxu1 %v3356_v10  ;;  %v3380_v10 = vld [vmem:[%s4265_s5 + $0x8] sm:$0xff]  }
 0x146   : > { %1176 = vmatprep.subr.bf16.mxu1 %v3493_v2 }
 0x149   : > { %1177 = vmatpush1.bf16.msra.mxu1 %v3357_v11  ;;  %v3381_v11 = vld [vmem:[%s4265_s5 + $0x10] sm:$0xff]  }
 0x14a   : > { %1178 = vmatprep.subr.bf16.mxu1 %v3493_v2 }
 0x14d   : > { %1179 = vmatpush1.bf16.msra.mxu1 %v3358_v12  ;;  %v3382_v12 = vld [vmem:[%s4265_s5 + $0x18] sm:$0xff]  }
 0x14e   : > { %1180 = vmatprep.subr.bf16.mxu1 %v3493_v2 }
 0x151   : > { %1181 = vmatpush1.bf16.msra.mxu1 %v3359_v13  ;;  %v3383_v13 = vld [vmem:[%s4265_s5 + $0x20] sm:$0xff]  }
 0x152   : > { %1182 = vmatprep.subr.bf16.mxu1 %v3493_v2  ;;  %v3363_v2 = vld [vmem:[%s4265_s5 + $0x40] sm:$0xff]  }
 0x155   : > { %1183 = vmatpush1.bf16.msra.mxu1 %v3360_v14  ;;  %v3384_v14 = vld [vmem:[%s4265_s5 + $0x28] sm:$0xff]  }
 0x156   : > { %3000 = vmatprep.subr.bf16.mxu1 %v3494_v15 }
 0x158   : > { %1189 = vmatmul.mubr.bf16.vlgmr.msra.gmra.mrb[16].mxu1 %v3815_v45  ;;  %v3368_v45 = vld [vmem:[%s4265_s5 + $0x90] sm:$0xff]  }
 0x159   : > { %2718 = vmatprep.mubr.msk.bf16.mxu1 %vm987_vm4, %v874_v1  ;;  %3001 = vmatpush3.bf16.msra.mxu1 %v3363_v2  ;;  %v3385_v2 = vld [vmem:[%s4265_s5 + $0x30] sm:$0xff]  }
 0x15a   : > { %3002 = vmatprep.subr.bf16.mxu1 %v3494_v15 }
 0x15d   : > { %3003 = vmatpush3.bf16.msra.mxu1 %v3365_v16  ;;  %v3386_v16 = vld [vmem:[%s4265_s5 + $0x38] sm:$0xff]  }
 0x15e   : > { %3004 = vmatprep.subr.bf16.mxu1 %v3494_v15 }
 0x160   : > { %1197 = vmatmul.mubr.bf16.gmra.mrb[20].mxu1 %v873_v0 }
 0x161   : > { %3016 = vmatprep.mubr.msk.bf16.mxu1 %vm3495_vm5, %v3494_v15  ;;  %3005 = vmatpush3.bf16.msra.mxu1 %v3367_v17 }
 0x162   : > { %3006 = vmatprep.subr.bf16.mxu1 %v3494_v15 }
 0x165   : > { %3007 = vmatpush3.bf16.msra.mxu1 %v3369_v46 }
 0x166   : > { %3008 = vmatprep.subr.bf16.mxu1 %v3494_v15 }
 0x169   : > { %3009 = vmatpush3.bf16.msra.mxu1 %v3371_v48 }
 0x16a   : > { %3010 = vmatprep.subr.bf16.mxu1 %v3494_v15 }
 0x16d   : > { %3011 = vmatpush3.bf16.msra.mxu1 %v3373_v50 }
 0x16e   : > { %3012 = vmatprep.subr.bf16.mxu1 %v3494_v15 }
 0x171   : > { %3013 = vmatpush3.bf16.msra.mxu1 %v3375_v52 }
 0x172   : > { %3014 = vmatprep.subr.bf16.mxu1 %v3494_v15 }
 0x175   : > { %3015 = vmatpush3.bf16.msra.mxu1 %v3377_v54 }
 0x176   : > { %3020 = vmatprep.subr.bf16.mxu1 %v3494_v15 }
 0x1f3   : > { %v1028_v18 = vpop.f32.mrb[8].mxu1 }
 0x1f4   : > { %v1030_v19 = vpop.f32.mrb[9].mxu1 }
 0x1f5   : > { %v1031_v20 = vpop.f32.mrb[10].mxu1  ;;  %v3387_v19 = vld [vmem:[%s4267_s7] sm:$0xff]  }
 0x1f6   : > { %v1033_v21 = vpop.f32.mrb[11].mxu1 }
 0x1f7   : > { %v3389_v21 = vld [vmem:[%s4267_s7 + $0x8] sm:$0xff]  }
 0x1fb   : > { %v1036_v22 = vpop.f32.mrb[12].mxu1 }
 0x1fc   : > { %v1038_v23 = vpop.f32.mrb[13].mxu1 }
 0x1fd   : > { %v1039_v24 = vpop.f32.mrb[14].mxu1  ;;  %v3391_v23 = vld [vmem:[%s4267_s7 + $0x10] sm:$0xff]  }
 0x1fe   : > { %v1041_v25 = vpop.f32.mrb[15].mxu1 }
 0x1ff   : > { %v3393_v25 = vld [vmem:[%s4267_s7 + $0x18] sm:$0xff]  }
 0x22b   : > { %v1190_v26 = vpop.f32.mrb[16].mxu1 }
 0x22c   : > { %v1205_v27 = vmax.f32 %v1028_v18, %v1190_v26  ;;  %v1192_v28 = vpop.f32.mrb[17].mxu1  ;;  %v3394_v26 = vld [vmem:[%s4267_s7 + $0x50] sm:$0xff]  }
 0x22d   : > { %v1193_v29 = vpop.f32.mrb[18].mxu1  ;;  %v3396_v28 = vld [vmem:[%s4267_s7 + $0x58] sm:$0xff]  }
 0x22e   : > { %v1206_v30 = vmax.f32 %v1031_v20, %v1193_v29  ;;  %v1195_v31 = vpop.f32.mrb[19].mxu1  ;;  %v3388_v20 = vld [vmem:[%s4267_s7 + $0x38] sm:$0xff]   ;;  %v3397_v29 = vld [vmem:[%s4267_s7 + $0x28] sm:$0xff]  }
 0x22f   : > { %v3399_v31 = vld [vmem:[%s4267_s7 + $0x30] sm:$0xff]  }
 0x230   : > { %v1209_v32 = vpack.c.bf16 %v1206_v30, %v1205_v27  ;;  %v3395_v27 = vld [vmem:[%s4267_s7 + $0x20] sm:$0xff]  }
 0x231   : > { %v3398_v30 = vld [vmem:[%s4267_s7 + $0x60] sm:$0xff]  }
 0x232   : > { %2985 = vmatpush3.bf16.msra.mxu0 %v1209_v32 }
 0x233   : > { %v1198_v33 = vpop.f32.mrb[20].mxu1  ;;  %2986 = vmatprep.subr.bf16.mxu0 %v3494_v15 }
 0x234   : > { %v1207_v34 = vmax.f32 %v1036_v22, %v1198_v33  ;;  %v1200_v35 = vpop.f32.mrb[21].mxu1  ;;  %v3390_v22 = vld [vmem:[%s4267_s7 + $0x40] sm:$0xff]  }
 0x235   : > { %v1201_v36 = vpop.f32.mrb[22].mxu1 }
 0x236   : > { %v1208_v37 = vmax.f32 %v1039_v24, %v1201_v36  ;;  %v1203_v38 = vpop.f32.mrb[23].mxu1  ;;  %v3392_v24 = vld [vmem:[%s4267_s7 + $0x48] sm:$0xff]  }
 0x238   : > { %v1210_v39 = vpack.c.bf16 %v1208_v37, %v1207_v34 }
 0x23a   : > { %v1224_v40 = vsel %vm1222_vm6, %v1210_v39, 0 }
 0x23b   : > { %2987 = vmatpush3.bf16.msra.mxu0 %v1224_v40 }
 0x23c   : > { %2992 = vmatprep.subr.bf16.mxu0 %v3494_v15 }
 0x23e   : > { %2989 = vmatmul.mubr.msk.bf16.vlgmr.msra.gmra.mrb[8].mxu0 %vm1218_vm7, %v3361_v41 }
 0x23f   : > { %2993 = vmatpush3.bf16.msra.mxu0 %v1209_v32  ;;  %2996 = vmatprep.mubr.msk.bf16.mxu0 %vm3495_vm5, %v3494_v15  ;;  %v3400_v32 = vld [vmem:[%s4267_s7 + $0x68] sm:$0xff]  }
 0x240   : > { %2994 = vmatprep.subr.bf16.mxu0 %v3494_v15 }
 0x243   : > { %2995 = vmatpush3.bf16.msra.mxu0 %v1224_v40 }
 0x244   : > { %3040 = vmatprep.subr.bf16.mxu0 %v3494_v15 }
 0x246   : > { %2997 = vmatmul.mubr.msk.bf16.vlgmr.msra.gmra.mrb[12].mxu0 %vm1218_vm7, %v3362_v42 }
 0x247   : > { %3041 = vmatpush3.bf16.msra.mxu0 %v3364_v43  ;;  %3056 = vmatprep.mubr.msk.bf16.mxu0 %vm3495_vm5, %v3494_v15 }
 0x248   : > { %3042 = vmatprep.subr.bf16.mxu0 %v3494_v15 }
 0x24b   : > { %3043 = vmatpush3.bf16.msra.mxu0 %v3366_v44  ;;  %v2781_v44 = vld [vmem:[%s4266_s6] ss:$0 sm:$0xff] }
 0x24c   : > { %3044 = vmatprep.subr.bf16.mxu0 %v3494_v15 }
 0x24f   : > { %3045 = vmatpush3.bf16.msra.mxu0 %v3368_v45 }
 0x250   : > { %3046 = vmatprep.subr.bf16.mxu0 %v3494_v15 }
 0x253   : > { %3047 = vmatpush3.bf16.msra.mxu0 %v3370_v47 }
 0x254   : > { %3048 = vmatprep.subr.bf16.mxu0 %v3494_v15 }
 0x257   : > { %3049 = vmatpush3.bf16.msra.mxu0 %v3372_v49 }
 0x258   : > { %3050 = vmatprep.subr.bf16.mxu0 %v3494_v15 }
 0x25b   : > { %3051 = vmatpush3.bf16.msra.mxu0 %v3374_v51 }
 0x25c   : > { %3052 = vmatprep.subr.bf16.mxu0 %v3494_v15 }
 0x25f   : > { %3053 = vmatpush3.bf16.msra.mxu0 %v3376_v53 }
 0x260   : > { %3054 = vmatprep.subr.bf16.mxu0 %v3494_v15 }
 0x263   : > { %3055 = vmatpush3.bf16.msra.mxu0 %v3378_v55 }
 0x264   : > { %3078 = vmatprep.subr.bf16.mxu0 %v3494_v15 }
 0x311   : > { %v1260_v56 = vpop.f32.mrb[8].mxu0 }
 0x312   : > { %v2990_v57 = vpop.f32.mrb[9].mxu0 }
 0x313   : > { %v1263_v58 = vpop.f32.mrb[10].mxu0 }
 0x314   : > { %v2991_v59 = vpop.f32.mrb[11].mxu0 }
 0x319   : > { %v1312_v60 = vpop.f32.mrb[12].mxu0 }
 0x31a   : > { %v1319_v61 = vmax.f32 %v1260_v56, %v1312_v60  ;;  %v2998_v62 = vpop.f32.mrb[13].mxu0 }
 0x31b   : > { %v1315_v63 = vpop.f32.mrb[14].mxu0 }
 0x31c   : > { %1321 = vst [vmem:[#allocation2] sm:$0xff] %v1319_v61  ;;  %v1320_v0 = vmax.f32 %v1263_v58, %v1315_v63  ;;  %v2999_v1 = vpop.f32.mrb[15].mxu0 }
 0x31e   : > { %1322 = vst [vmem:[#allocation2 + $0x8] sm:$0xff] %v1320_v0 }
 0x325   : > { %v1342_v4 = vld [vmem:[#allocation2 + $0x1] sm:$0xff]  ;;  %v1343_v5 = vld [vmem:[#allocation2 + $0x9] sm:$0x3f] }
 0x326   : > { %v1540_v6 = vld [vmem:[#allocation2 + $0x2] sm:$0xff]  ;;  %v1344_v7 = vpack.c.bf16 %v1343_v5, %v1342_v4  ;;  %v1541_v8 = vld [vmem:[#allocation2 + $0xa] sm:$0x3f] }
 0x327   : > { %v1542_v9 = vpack.c.bf16 %v1541_v8, %v1540_v6  ;;  %v1324_v17 = vld [vmem:[#allocation2 + $0x8] sm:$0x3f]  ;;  %v1865_v4 = vld [vmem:[%s4268_s8] sm:$0xf]  ;;  %v2813_v5 = vld [vmem:[%s4268_s8 + $0x4] sm:$0xf] }
 0x328   : > { %3017 = vmatmul.mubr.bf16.vlgmr.msra.gmra.mrb[24].mxu1 %v1344_v7  ;;  %v1325_v18 = vpack.c.bf16 %v1324_v17, %v1319_v61  ;;  %v3401_v6 = vld [vmem:[%s4269_s9] sm:$0xff]   ;;  %v3402_v7 = vld [vmem:[%s4269_s9 + $0x8] sm:$0xff]   ;;  %v3403_v8 = vld [vmem:[%s4269_s9 + $0x10] sm:$0xff]  }
 0x329   : > { %3021 = vmatpush3.bf16.msra.mxu1 %v3379_v3  ;;  %3057 = vmatmul.mubr.bf16.vlgmr.msra.gmra.mrb[16].mxu0 %v1542_v9  ;;  %v3404_v9 = vld [vmem:[%s4269_s9 + $0x18] ss:$0 sps:$4 sm:$0xff]  }
 0x32a   : > { %3022 = vmatprep.subr.bf16.mxu1 %v3494_v15  ;;  %3036 = vmatprep.mubr.msk.bf16.mxu1 %vm3495_vm5, %v3494_v15 }
 0x32b   : > { %3092 = vmatprep.mubr.msk.bf16.mxu0 %vm3495_vm5, %v3494_v15  ;;  %3079 = vmatpush3.bf16.msra.mxu0 %v3388_v20 }
 0x32c   : > { %3080 = vmatprep.subr.bf16.mxu0 %v3494_v15 }
 0x32d   : > { %3023 = vmatpush3.bf16.msra.mxu1 %v3380_v10  ;;  %v1999_v10 = vsel %vm1997_vm10, %v3404_v9, 0 }
 0x32e   : > { %3024 = vmatprep.subr.bf16.mxu1 %v3494_v15 }
 0x32f   : > { %3081 = vmatpush3.bf16.msra.mxu0 %v3390_v22 }
 0x330   : > { %3082 = vmatprep.subr.bf16.mxu0 %v3494_v15 }
 0x331   : > { %3025 = vmatpush3.bf16.msra.mxu1 %v3381_v11 }
 0x332   : > { %3026 = vmatprep.subr.bf16.mxu1 %v3494_v15 }
 0x333   : > { %3083 = vmatpush3.bf16.msra.mxu0 %v3392_v24  ;;  %v3407_v24 = vld [vmem:[%s4269_s9 + $0x2c] sm:$0xff]  }
 0x334   : > { %3084 = vmatprep.subr.bf16.mxu0 %v3494_v15 }
 0x335   : > { %3027 = vmatpush3.bf16.msra.mxu1 %v3382_v12 }
 0x336   : > { %3028 = vmatprep.subr.bf16.mxu1 %v3494_v15 }
 0x337   : > { %3085 = vmatpush3.bf16.msra.mxu0 %v3394_v26 }
 0x338   : > { %3086 = vmatprep.subr.bf16.mxu0 %v3494_v15 }
 0x339   : > { %3029 = vmatpush3.bf16.msra.mxu1 %v3383_v13 }
 0x33a   : > { %3030 = vmatprep.subr.bf16.mxu1 %v3494_v15 }
 0x33b   : > { %3087 = vmatpush3.bf16.msra.mxu0 %v3396_v28  ;;  %v3409_v28 = vld [vmem:[%s4269_s9 + $0x38] sm:$0xff]  }
 0x33c   : > { %3088 = vmatprep.subr.bf16.mxu0 %v3494_v15 }
 0x33d   : > { %3031 = vmatpush3.bf16.msra.mxu1 %v3384_v14 }
 0x33e   : > { %3032 = vmatprep.subr.bf16.mxu1 %v3494_v15 }
 0x33f   : > { %3089 = vmatpush3.bf16.msra.mxu0 %v3398_v30  ;;  %v3410_v30 = vld [vmem:[%s4269_s9 + $0x40] sm:$0xff]  }
 0x340   : > { %3090 = vmatprep.subr.bf16.mxu0 %v3494_v15 }
 0x341   : > { %3033 = vmatpush3.bf16.msra.mxu1 %v3385_v2 }
 0x342   : > { %3034 = vmatprep.subr.bf16.mxu1 %v3494_v15 }
 0x343   : > { %3091 = vmatpush3.bf16.msra.mxu0 %v3400_v32  ;;  %v3412_v32 = vld [vmem:[%s4269_s9 + $0x50] ss:$0 sps:$4 sm:$0xff]  }
 0x344   : > { %3108 = vmatprep.subr.bf16.mxu0 %v3494_v15 }
 0x345   : > { %3035 = vmatpush3.bf16.msra.mxu1 %v3386_v16 }
 0x346   : > { %3060 = vmatprep.subr.bf16.mxu1 %v3494_v15 }
 0x348   : > { %3037 = vmatmul.mubr.bf16.vlgmr.msra.gmra.mrb[28].mxu1 %v1325_v18 }
 0x349   : > { %3074 = vmatprep.mubr.msk.bf16.mxu1 %vm3495_vm5, %v3494_v15  ;;  %3061 = vmatpush3.bf16.msra.mxu1 %v3387_v19 }
 0x34a   : > { %3062 = vmatprep.subr.bf16.mxu1 %v3494_v15 }
 0x34d   : > { %3063 = vmatpush3.bf16.msra.mxu1 %v3389_v21  ;;  %v3405_v21 = vld [vmem:[%s4269_s9 + $0x1c] sm:$0xff]  }
 0x34e   : > { %3064 = vmatprep.subr.bf16.mxu1 %v3494_v15 }
 0x351   : > { %3065 = vmatpush3.bf16.msra.mxu1 %v3391_v23  ;;  %v3406_v23 = vld [vmem:[%s4269_s9 + $0x24] sm:$0xff]  }
 0x352   : > { %3066 = vmatprep.subr.bf16.mxu1 %v3494_v15 }
 0x355   : > { %3067 = vmatpush3.bf16.msra.mxu1 %v3393_v25  ;;  %v3408_v25 = vld [vmem:[%s4269_s9 + $0x34] ss:$0 sps:$4 sm:$0xff]  }
 0x356   : > { %3068 = vmatprep.subr.bf16.mxu1 %v3494_v15  ;;  %v2077_v26 = vsel %vm1997_vm10, %v3408_v25, 0 }
 0x359   : > { %3069 = vmatpush3.bf16.msra.mxu1 %v3395_v27 }
 0x35a   : > { %3070 = vmatprep.subr.bf16.mxu1 %v3494_v15 }
 0x35d   : > { %3071 = vmatpush3.bf16.msra.mxu1 %v3397_v29 }
 0x35e   : > { %3072 = vmatprep.subr.bf16.mxu1 %v3494_v15 }
 0x361   : > { %3073 = vmatpush3.bf16.msra.mxu1 %v3399_v31  ;;  %v3411_v31 = vld [vmem:[%s4269_s9 + $0x48] sm:$0xff]  }
 0x362   : > { %3096 = vmatprep.subr.bf16.mxu1 %v3494_v15 }
 0x3fb   : > { %v1444_v33 = vpop.f32.mrb[24].mxu1 }
 0x3fc   : > { %v1642_v34 = vpop.f32.mrb[16].mxu0  ;;  %v3018_v35 = vpop.f32.mrb[25].mxu1 }
 0x3fd   : > { %v3058_v36 = vpop.f32.mrb[17].mxu0  ;;  %v1447_v37 = vpop.f32.mrb[26].mxu1  ;;  %v3413_v35 = vld [vmem:[%s4269_s9 + $0x54] sm:$0xff]  }
 0x3fe   : > { %v1645_v38 = vpop.f32.mrb[18].mxu0  ;;  %v3019_v39 = vpop.f32.mrb[27].mxu1 }
 0x3ff   : > { %v3059_v40 = vpop.f32.mrb[19].mxu0  ;;  %v3416_v39 = vld [vmem:[%s4269_s9 + $0x6c] ss:$0 sps:$4 sm:$0xff]  }
 0x400   : > { %v2233_v40 = vsel %vm1997_vm10, %v3416_v39, 0 }
 0x41b   : > { %v1533_v41 = vpop.f32.mrb[28].mxu1 }
 0x41c   : > { %v1534_v42 = vadd.f32 %v1533_v41, %v1444_v33  ;;  %v3038_v43 = vpop.f32.mrb[29].mxu1  ;;  %v2155_v33 = vsel %vm1997_vm10, %v3412_v32, 0 }
 0x41d   : > { %v1536_v45 = vpop.f32.mrb[30].mxu1 }
 0x41e   : > { %v1649_v46 = vadd.f32 %v1642_v34, %v1534_v42  ;;  %v1537_v47 = vadd.f32 %v1536_v45, %v1447_v37  ;;  %v3039_v48 = vpop.f32.mrb[31].mxu1  ;;  %v3414_v37 = vld [vmem:[%s4269_s9 + $0x5c] sm:$0xff]   ;;  %v3417_v42 = vld [vmem:[%s4269_s9 + $0x70] sm:$0xff]  }
 0x41f   : > { %v3419_v45 = vld [vmem:[%s4269_s9 + $0x80] sm:$0xff]  }
 0x420   : > { %v1658_v49 = vadd.f32 %v2781_v44, %v1649_v46  ;;  %v1650_v50 = vadd.f32 %v1645_v38, %v1537_v47  ;;  %v3415_v38 = vld [vmem:[%s4269_s9 + $0x64] sm:$0xff]  }
 0x421   : > { %v3420_v46 = vld [vmem:[%s4269_s9 + $0x88] ss:$0 sps:$4 sm:$0xff]  }
 0x422   : > { %v1659_v51 = vadd.f32 %v2781_v44, %v1650_v50  ;;  %v1660_v52 = vmax.f32 %v1658_v49, 0.0  ;;  %v3418_v44 = vld [vmem:[%s4269_s9 + $0x78] sm:$0xff]   ;;  %v2311_v47 = vsel %vm1997_vm10, %v3420_v46, 0  ;;  %v3421_v49 = vld [vmem:[%s4269_s9 + $0x8c] sm:$0xff]  }
 0x424   : > { %v1661_v53 = vmax.f32 %v1659_v51, 0.0  ;;  %v3422_v51 = vld [vmem:[%s4269_s9 + $0x94] sm:$0xff]  }
 0x426   : > { %v1662_v54 = vpack.c.bf16 %v1661_v53, %v1660_v52  ;;  %v3423_v52 = vld [vmem:[%s4269_s9 + $0x9c] sm:$0xff]   ;;  %v3424_v53 = vld [vmem:[%s4269_s9 + $0xa4] ss:$0 sps:$4 sm:$0xff]  }
 0x428   : > { %3075 = vmatmul.mubr.msk.bf16.vlgmr.msra.gmra.mrb[32].mxu1 %vm1719_vm8, %v1662_v54  ;;  %3093 = vmatmul.mubr.msk.bf16.vlgmr.msra.gmra.mrb[20].mxu0 %vm1719_vm8, %v1662_v54  ;;  %v2389_v54 = vsel %vm1997_vm10, %v3424_v53, 0 }
 0x429   : > { %3098 = vmatprep.mubr.msk.bf16.mxu1 %vm3495_vm5, %v3494_v15  ;;  %3116 = vmatprep.mubr.msk.bf16.mxu0 %vm3495_vm5, %v3494_v15 }
 0x42a   : > { %3109 = vmatpush3.bf16.msra.mxu0 %v3401_v6 }
 0x42b   : > { %3110 = vmatprep.subr.bf16.mxu0 %v3494_v15 }
 0x42e   : > { %3111 = vmatpush3.bf16.msra.mxu0 %v3402_v7 }
 0x42f   : > { %3112 = vmatprep.subr.bf16.mxu0 %v3494_v15 }
 0x432   : > { %3113 = vmatpush3.bf16.msra.mxu0 %v3403_v8 }
 0x433   : > { %3114 = vmatprep.subr.bf16.mxu0 %v3494_v15 }
 0x436   : > { %3115 = vmatpush3.bf16.msra.mxu0 %v1999_v10 }
 0x437   : > { %3120 = vmatprep.subr.bf16.mxu0 %v3494_v15 }
 0x4fb   : > { %v1757_v55 = vpop.f32.mrb[32].mxu1  ;;  %v1855_v56 = vpop.f32.mrb[20].mxu0 }
 0x4fc   : > { %v1862_v57 = vmax.f32 %v1757_v55, %v1855_v56  ;;  %v3076_v58 = vpop.f32.mrb[33].mxu1  ;;  %v3094_v59 = vpop.f32.mrb[21].mxu0  ;;  %v3425_v56 = vld [vmem:[%s4269_s9 + $0xa8] sm:$0xff]  }
 0x4fd   : > { %v1760_v60 = vpop.f32.mrb[34].mxu1  ;;  %v1858_v61 = vpop.f32.mrb[22].mxu0  ;;  %v3426_v58 = vld [vmem:[%s4269_s9 + $0xb0] sm:$0xff]   ;;  %v3427_v59 = vld [vmem:[%s4269_s9 + $0xb8] sm:$0xff]  }
 0x4fe   : > { %v1863_v62 = vmax.f32 %v1760_v60, %v1858_v61  ;;  %v3077_v63 = vpop.f32.mrb[35].mxu1  ;;  %v3095_v0 = vpop.f32.mrb[23].mxu0  ;;  %v3428_v60 = vld [vmem:[%s4269_s9 + $0xc0] ss:$0 sps:$4 sm:$0xff]  }
 0x4ff   : > { %v2467_v61 = vsel %vm1997_vm10, %v3428_v60, 0  ;;  %v1962_v0 = vld [vmem:[%s4270_s10] sm:$0x1] }
 0x500   : > { %v1864_v1 = vpack.c.bf16 %v1863_v62, %v1862_v57 }
 0x502   : > { %v1872_v3 = vsel %vm708_vm3, %v1864_v1, 0 }
 0x503   : > { %3097 = vmatpush3.bf16.msra.mxu1 %v1872_v3 }
 0x504   : > { %3102 = vmatprep.subr.bf16.mxu1 %v3494_v15 }
 0x506   : > { %3099 = vmatmul.mubr.msk.bf16.vlgmr.msra.gmra.mrb[36].mxu1 %vm1866_vm9, %v1865_v4 }
 0x507   : > { %3103 = vmatpush3.bf16.msra.mxu1 %v1872_v3  ;;  %3104 = vmatprep.mubr.msk.bf16.mxu1 %vm3495_vm5, %v3494_v15 }
 0x50e   : > { %3105 = vmatmul.mubr.msk.bf16.vlgmr.msra.gmra.mrb[40].mxu1 %vm1866_vm9, %v2813_v5 }
 0x5d9   : > { %v1908_v11 = vpop.f32.mrb[36].mxu1 }
 0x5da   : > { %v3100_v12 = vpop.f32.mrb[37].mxu1 }
 0x5db   : > { %v1911_v13 = vpop.f32.mrb[38].mxu1 }
 0x5dc   : > { %v3101_v14 = vpop.f32.mrb[39].mxu1 }
 0x5e1   : > { %v1953_v2 = vpop.f32.mrb[40].mxu1 }
 0x5e2   : > { %v1959_v16 = vmax.f32 %v1908_v11, %v1953_v2  ;;  %v3106_v17 = vpop.f32.mrb[41].mxu1 }
 0x5e3   : > { %v1956_v18 = vpop.f32.mrb[42].mxu1 }
 0x5e4   : > { %1961 = vst.msk [vmem:[#allocation3] sm:$0x7f] %vm1960_vm11, %v1959_v16  ;;  %v3107_v19 = vpop.f32.mrb[43].mxu1 }
 0x5eb   : > { %v1963_v20 = vld [vmem:[#allocation3] sm:$0x1]  ;;  %v2042_v27 = vld [vmem:[#allocation3 + $0x1] sm:$0x1]  ;;  %v2120_v34 = vld [vmem:[#allocation3 + $0x2] sm:$0x1] }
 0x5ec   : > { %v1964_v22 = vpack.c.bf16 %v1963_v20, %v1963_v20  ;;  %v2043_v29 = vpack.c.bf16 %v2042_v27, %v2042_v27  ;;  %v2121_v36 = vpack.c.bf16 %v2120_v34, %v2120_v34  ;;  %v2198_v41 = vld [vmem:[#allocation3 + $0x3] sm:$0x1]  ;;  %v2276_v48 = vld [vmem:[#allocation3 + $0x4] sm:$0x1]  ;;  %v2354_v55 = vld [vmem:[#allocation3 + $0x5] sm:$0x1] }
 0x5ed   : > { %v2199_v43 = vpack.c.bf16 %v2198_v41, %v2198_v41  ;;  %v2277_v50 = vpack.c.bf16 %v2276_v48, %v2276_v48  ;;  %v2355_v57 = vpack.c.bf16 %v2354_v55, %v2354_v55  ;;  %v2432_v62 = vld [vmem:[#allocation3 + $0x6] sm:$0x1] }
 0x5ee   : > { %3117 = vmatmul.mubr.msk.bf16.vlgmr.msra.gmra.mrb[24].mxu0 %vm1993_vm12, %v1964_v22  ;;  %v2433_v63 = vpack.c.bf16 %v2432_v62, %v2432_v62 }
 0x5ef   : > { %3121 = vmatpush3.bf16.msra.mxu0 %v3405_v21  ;;  %3128 = vmatprep.mubr.msk.bf16.mxu0 %vm3495_vm5, %v3494_v15 }
 0x5f0   : > { %3122 = vmatprep.subr.bf16.mxu0 %v3494_v15 }
 0x5f3   : > { %3123 = vmatpush3.bf16.msra.mxu0 %v3406_v23 }
 0x5f4   : > { %3124 = vmatprep.subr.bf16.mxu0 %v3494_v15 }
 0x5f7   : > { %3125 = vmatpush3.bf16.msra.mxu0 %v3407_v24 }
 0x5f8   : > { %3126 = vmatprep.subr.bf16.mxu0 %v3494_v15 }
 0x5fb   : > { %3127 = vmatpush3.bf16.msra.mxu0 %v2077_v26 }
 0x5fc   : > { %3132 = vmatprep.subr.bf16.mxu0 %v3494_v15 }
 0x5fe   : > { %3129 = vmatmul.mubr.msk.bf16.vlgmr.msra.gmra.mrb[24].mxu0 %vm1993_vm12, %v2043_v29 }
 0x5ff   : > { %3133 = vmatpush3.bf16.msra.mxu0 %v3409_v28  ;;  %3140 = vmatprep.mubr.msk.bf16.mxu0 %vm3495_vm5, %v3494_v15 }
 0x600   : > { %3134 = vmatprep.subr.bf16.mxu0 %v3494_v15 }
 0x603   : > { %3135 = vmatpush3.bf16.msra.mxu0 %v3410_v30 }
 0x604   : > { %3136 = vmatprep.subr.bf16.mxu0 %v3494_v15 }
 0x607   : > { %3137 = vmatpush3.bf16.msra.mxu0 %v3411_v31 }
 0x608   : > { %3138 = vmatprep.subr.bf16.mxu0 %v3494_v15 }
 0x60b   : > { %3139 = vmatpush3.bf16.msra.mxu0 %v2155_v33 }
 0x60c   : > { %3144 = vmatprep.subr.bf16.mxu0 %v3494_v15 }
 0x60e   : > { %3141 = vmatmul.mubr.msk.bf16.vlgmr.msra.gmra.mrb[24].mxu0 %vm1993_vm12, %v2121_v36 }
 0x60f   : > { %3145 = vmatpush3.bf16.msra.mxu0 %v3413_v35  ;;  %3152 = vmatprep.mubr.msk.bf16.mxu0 %vm3495_vm5, %v3494_v15 }
 0x610   : > { %3146 = vmatprep.subr.bf16.mxu0 %v3494_v15 }
 0x613   : > { %3147 = vmatpush3.bf16.msra.mxu0 %v3414_v37 }
 0x614   : > { %3148 = vmatprep.subr.bf16.mxu0 %v3494_v15 }
 0x617   : > { %3149 = vmatpush3.bf16.msra.mxu0 %v3415_v38 }
 0x618   : > { %3150 = vmatprep.subr.bf16.mxu0 %v3494_v15 }
 0x61b   : > { %3151 = vmatpush3.bf16.msra.mxu0 %v2233_v40 }
 0x61c   : > { %3156 = vmatprep.subr.bf16.mxu0 %v3494_v15 }
 0x61e   : > { %3153 = vmatmul.mubr.msk.bf16.vlgmr.msra.gmra.mrb[24].mxu0 %vm1993_vm12, %v2199_v43 }
 0x61f   : > { %3157 = vmatpush3.bf16.msra.mxu0 %v3417_v42  ;;  %3164 = vmatprep.mubr.msk.bf16.mxu0 %vm3495_vm5, %v3494_v15 }
 0x620   : > { %3158 = vmatprep.subr.bf16.mxu0 %v3494_v15 }
 0x623   : > { %3159 = vmatpush3.bf16.msra.mxu0 %v3418_v44 }
 0x624   : > { %3160 = vmatprep.subr.bf16.mxu0 %v3494_v15 }
 0x627   : > { %3161 = vmatpush3.bf16.msra.mxu0 %v3419_v45 }
 0x628   : > { %3162 = vmatprep.subr.bf16.mxu0 %v3494_v15 }
 0x62b   : > { %3163 = vmatpush3.bf16.msra.mxu0 %v2311_v47 }
 0x62c   : > { %3168 = vmatprep.subr.bf16.mxu0 %v3494_v15 }
 0x62e   : > { %3165 = vmatmul.mubr.msk.bf16.vlgmr.msra.gmra.mrb[24].mxu0 %vm1993_vm12, %v2277_v50 }
 0x62f   : > { %3169 = vmatpush3.bf16.msra.mxu0 %v3421_v49  ;;  %3176 = vmatprep.mubr.msk.bf16.mxu0 %vm3495_vm5, %v3494_v15 }
 0x630   : > { %3170 = vmatprep.subr.bf16.mxu0 %v3494_v15 }
 0x633   : > { %3171 = vmatpush3.bf16.msra.mxu0 %v3422_v51 }
 0x634   : > { %3172 = vmatprep.subr.bf16.mxu0 %v3494_v15 }
 0x637   : > { %3173 = vmatpush3.bf16.msra.mxu0 %v3423_v52 }
 0x638   : > { %3174 = vmatprep.subr.bf16.mxu0 %v3494_v15 }
 0x63b   : > { %3175 = vmatpush3.bf16.msra.mxu0 %v2389_v54 }
 0x63c   : > { %3180 = vmatprep.subr.bf16.mxu0 %v3494_v15 }
 0x63e   : > { %3177 = vmatmul.mubr.msk.bf16.vlgmr.msra.gmra.mrb[24].mxu0 %vm1993_vm12, %v2355_v57 }
 0x63f   : > { %3181 = vmatpush3.bf16.msra.mxu0 %v3425_v56  ;;  %3188 = vmatprep.mubr.msk.bf16.mxu0 %vm3495_vm5, %v3494_v15 }
 0x640   : > { %3182 = vmatprep.subr.bf16.mxu0 %v3494_v15 }
 0x643   : > { %3183 = vmatpush3.bf16.msra.mxu0 %v3426_v58 }
 0x644   : > { %3184 = vmatprep.subr.bf16.mxu0 %v3494_v15 }
 0x647   : > { %3185 = vmatpush3.bf16.msra.mxu0 %v3427_v59 }
 0x648   : > { %3186 = vmatprep.subr.bf16.mxu0 %v3494_v15 }
 0x64b   : > { %3187 = vmatpush3.bf16.msra.mxu0 %v2467_v61 }
 0x64e   : > { %3189 = vmatmul.mubr.msk.bf16.vlgmr.msra.gmra.mrb[24].mxu0 %vm1993_vm12, %v2433_v63 }
 0x721   : > { %v2503_v1 = vpop.f32.mrb[24].mxu0 }
 0x722   : > { %v3200_v3 = vadd.f32 %v2503_v1, %v1962_v0  ;;  %v3190_v15 = vpop.f32.mrb[25].mxu0 }
 0x723   : > { %v2506_v4 = vpop.f32.mrb[26].mxu0 }
 0x724   : > { %v3191_v5 = vpop.f32.mrb[27].mxu0  ;;  %2511 = vst.msk [vmem:[%s378_s25] sm:$0x1] %vm2510_vm13, %v3200_v3 }
 0x725   : > { %3442 = shalt.err (!%p3439_p3)
}
 0x726   : > { %s3443_s15 = scalar_lea.hbm %s4218_s12, 16  ;;  %s3447_s25 = scalar_lea.hbm %s4271_s11, 32 }
 0x727   : > { %p3444_p4 = scmp.ne.s32.totalorder %s4218_s12, %s3443_s15  ;;  %p3448_p9 = scmp.lt.u32.totalorder %s4218_s12, %s4271_s11 }
 0x728   : > { %p3449_p10 = scmp.lt.u32.totalorder %s3447_s25, %s3443_s15  ;;  %p3451_p12 = scmp.lt.u32.totalorder %s3443_s15, %s4218_s12 }
 0x729   : > { %p3445_p7 = pnand %p3444_p4, %p3595_p5 }
 0x72a   : > { %p3450_p11 = por %p3449_p10, %p3448_p9 }
 0x72b   : > { %p3446_p8 = pneg %p3445_p7 }
 0x72c   : > { %p3452_p13 = por %p3451_p12, %p3450_p11 }
 0x72e   : > { %p3453_p0 = pnand %p3452_p13, %p3446_p8 }
 0x730   : > { %3456 = shalt.err (!%p3453_p0)
}
 0x731   : > { %3233 = dma.vmem_to_hbm [thread:$0]  (%p3595_p5), %s4220_s29, 16, %s4218_s12, %s2513_s21  }
 0x732 PF: > { %p3239_p1 = scmp.ge.s32.totalorder %s3491_s20, 2  ;;  %s2537_s26 = sand.u32 1, %s3479_s17  }
 0x733   : > { %s2538_s14 = scalar_lea.sflag [#allocation5], %s2537_s26 }
 0x734   : > { %p3236_p2 = pnand %p3239_p1, %p3599_p6 }
 0x736   : > { %3474 = dma.done.wait (!%p3236_p2), %s2538_s14, 16  }
 0x737   : > { %3476 = vsyncadd (!%p3236_p2), %s2538_s14, 4294967280  ;;  %s4277_s19 = sld [smem:[#allocation7_spill]]  ;;  %s4278_s16 = sld [smem:[#allocation8_spill]] }
 0x738   : > { %p21_p3 = scmp.ge.s32.totalorder %s3582_s23, 4   ;;  %s4279_s17 = smov %s3483_s18 }
 0x739   : > { %s4282_s20 = smov %s3582_s23 }
 0x73a   :  { %23 = sbr.rel (!%p21_p3) target bundleno = 3 (0x3), region = 113 }
 0x73d   : > { %s4280_s18 = smov %s4277_s19  ;;  %s4281_s19 = smov %s4278_s16 }
 0x741   :  { %2542 = vsyncpa [#allocation5], 1 }
 0x742   :  { %2544 = vsyncpa [#allocation5 + $0x1], 1 }

</bundles_post_ra>
